<compile_context>
chip_gen: v7x
topology: tpu7x:2x2x1
jax: 0.10.0
libtpu: 0.0.40
codegen_flags: <defaults>
</compile_context>

<pallas_src>
import jax
import jax.numpy as jnp
from jax.experimental import pallas as pl
from jax.experimental.pallas import tpu as pltpu

LANE = 128  # TPU lane width; channel dims are padded to a multiple of this


def _round_up(x, m):
    return ((x + m - 1) // m) * m


def _pick_row_tile(h):
    """Largest 'nice' row-tile (~8 rows) that divides H."""
    for t in (8, 7, 16, 14, 12, 10, 6, 5, 4, 3, 2, 1):
        if h % t == 0:
            return t
    return h


# ----------------------------------------------------------------------------
# Pallas kernel: one grid step = TH output rows of one image.
# ----------------------------------------------------------------------------
def _bottleneck_kernel(x_ref,            # (H+2, W, Cp) bf16  full image, 1 zero halo row top/bottom
                       w1_ref, b1_ref,   # (Cp, Wp) bf16, (1, Wp) f32   (BN1 folded)
                       w2_ref, b2_ref,   # (3, 3*Wp, Wp) bf16, (1, Wp) f32 (BN2 folded, dx folded into K)
                       w3_ref, b3_ref,   # (Wp, Cp) bf16, (1, Cp) f32   (BN3 folded)
                       out_ref,          # (TH, W, Cp) f32   one row tile
                       col_ref):         # VMEM scratch (TH+2, W, 3*Wp) bf16: dx-unrolled conv1 output
    TH, W, Cp = out_ref.shape
    Wp = w1_ref.shape[1]
    r = pl.program_id(1)
    h0 = pl.multiple_of(r * TH, TH)          # first output row of this tile

    # ---- conv1x1 (BN1 folded) + relu on TH+2 rows (tile + 1-row halo) -------
    xin = x_ref[pl.ds(h0, TH + 2), :, :]                        # bf16, resident block
    t1 = jnp.dot(xin.reshape((TH + 2) * W, Cp), w1_ref[...],
                 preferred_element_type=jnp.float32)
    t1 = jnp.maximum(t1 + b1_ref[...], 0.0)
    t1 = t1.reshape(TH + 2, W, Wp).astype(jnp.bfloat16)

    # ---- stage t1 into the dx-unrolled scratch ------------------------------
    # col_ref[i, w, dx*Wp + c] = t1[i, w + dx - 1, c]  (zero where out of range)
    col_ref[:, :, Wp:2 * Wp] = t1                               # dx = 1 (center tap)
    col_ref[:, 1:W, 0:Wp] = t1[:, 0:W - 1, :]                   # dx = 0 (left tap)
    col_ref[:, 0:W - 1, 2 * Wp:3 * Wp] = t1[:, 1:W, :]          # dx = 2 (right tap)
    # Column halo of the 3x3 conv (never written above): zero only these thin
    # strips every step (tiny stores).  Re-zeroing per step (instead of a
    # one-time memset at step (0,0)) keeps the kernel correct when the
    # 'parallel' grid axes are split across TensorCores (v7x megacore).
    col_ref[:, 0:1, 0:Wp] = jnp.zeros((TH + 2, 1, Wp), jnp.bfloat16)
    col_ref[:, W - 1:W, 2 * Wp:3 * Wp] = jnp.zeros((TH + 2, 1, Wp), jnp.bfloat16)

    # Row halo: at the image top/bottom the staged halo row came from the
    # zero-padded input row, whose conv1 output is relu(b1) != 0 — overwrite it
    # with the true zero padding of the 3x3 conv.
    @pl.when(r == 0)
    def _():
        col_ref[0:1, :, :] = jnp.zeros((1, W, 3 * Wp), jnp.bfloat16)

    @pl.when(r == pl.num_programs(1) - 1)
    def _():
        col_ref[TH + 1:TH + 2, :, :] = jnp.zeros((1, W, 3 * Wp), jnp.bfloat16)

    # ---- conv3x3 (BN2 folded): 3 MXU matmuls with K = 3*Wp ------------------
    # Successive dots added into one accumulator (v7x MRB-friendly); the first
    # dot initializes it (no zeros-broadcast + add).
    acc = jnp.dot(col_ref[0:TH, :, :].reshape(TH * W, 3 * Wp), w2_ref[0],
                  preferred_element_type=jnp.float32)
    acc += jnp.dot(col_ref[1:TH + 1, :, :].reshape(TH * W, 3 * Wp), w2_ref[1],
                   preferred_element_type=jnp.float32)
    acc += jnp.dot(col_ref[2:TH + 2, :, :].reshape(TH * W, 3 * Wp), w2_ref[2],
                   preferred_element_type=jnp.float32)
    t2 = jnp.maximum(acc + b2_ref[...], 0.0)

    # ---- conv1x1 (BN3 folded) + residual add + relu -------------------------
    t3 = jnp.dot(t2.astype(jnp.bfloat16), w3_ref[...],
                 preferred_element_type=jnp.float32)
    # Residual read straight from the resident input block (no long-lived copy).
    xres = x_ref[pl.ds(h0 + 1, TH), :, :].reshape(TH * W, Cp).astype(jnp.float32)
    out = jnp.maximum(t3 + b3_ref[...] + xres, 0.0)             # Cin == Cout
    out_ref[...] = out.reshape(TH, W, Cp).astype(out_ref.dtype)


# ----------------------------------------------------------------------------
# Parameter folding / packing (host side, once per block)
# ----------------------------------------------------------------------------
def _fold_bn(gamma, beta, mean, var, eps=1e-5):
    scale = gamma / jnp.sqrt(var + eps)
    bias = beta - mean * scale
    return scale.reshape(1, -1), bias.reshape(1, -1)


def pack_params(p, lane=LANE):
    """Fold BN scales into conv weights, zero-pad channels to a multiple of
    `lane`, fold the dx tap of the 3x3 conv into the contraction dim
    (K = 3*width), and cast MXU weights to bf16."""
    w1 = p["w1"] * p["s1"]                     # (Cin, Wd), scale on out-channel
    w2 = p["w2"] * p["s2"][0]                  # (3, 3, Wd, Wd)  (dy, dx, in, out)
    w3 = p["w3"] * p["s3"]                     # (Wd, Cout)
    b1, b2, b3 = p["b1"], p["b2"], p["b3"]

    cin, wd = w1.shape
    cout = w3.shape[1]
    cin_p, wd_p, cout_p = (_round_up(c, lane) for c in (cin, wd, cout))

    w1 = jnp.pad(w1, ((0, cin_p - cin), (0, wd_p - wd)))
    w2 = jnp.pad(w2, ((0, 0), (0, 0), (0, wd_p - wd), (0, wd_p - wd)))
    w3 = jnp.pad(w3, ((0, wd_p - wd), (0, cout_p - cout)))
    b1 = jnp.pad(b1, ((0, 0), (0, wd_p - wd)))
    b2 = jnp.pad(b2, ((0, 0), (0, wd_p - wd)))
    b3 = jnp.pad(b3, ((0, 0), (0, cout_p - cout)))

    # Fold dx into K: rows [dx*wd_p:(dx+1)*wd_p] of w2f[dy] hold w2[dy, dx].
    w2 = w2.reshape(3, 3 * wd_p, wd_p)

    return dict(w1=w1.astype(jnp.bfloat16), b1=b1.astype(jnp.float32),
                w2=w2.astype(jnp.bfloat16), b2=b2.astype(jnp.float32),
                w3=w3.astype(jnp.bfloat16), b3=b3.astype(jnp.float32))


# ----------------------------------------------------------------------------
# Public wrapper
# ----------------------------------------------------------------------------
@jax.jit
def bottleneck_forward(x_nchw, packed):
    """x_nchw: (N, Cin, H, W) float32; packed: output of pack_params."""
    N, Cin, H, W = x_nchw.shape
    Cp, Wp = packed["w1"].shape        # padded in/out channels, padded width
    TH = _pick_row_tile(H)
    R = H // TH

    # TODO(synk): for stacks of blocks keep activations bf16 NHWC with padded
    # channels between blocks and convert NCHW<->NHWC only at stage boundaries.
    x = jnp.transpose(x_nchw, (0, 2, 3, 1)).astype(jnp.bfloat16)   # NCHW->NHWC, bf16 at HBM boundary
    # One pad op: zero halo row above/below + channel pad to Cp.
    x = jnp.pad(x, ((0, 0), (1, 1), (0, 0), (0, Cp - Cin)))

    # Grid-invariant weights/biases: constant index maps -> never re-DMA'd.
    # TODO(synk): single-buffer them (pipeline_mode=pl.Buffered(1)) to halve
    # their VMEM footprint on large stages (matters most on v7x's 64 MiB VMEM);
    # likewise Buffered(3) on the activation specs for v5e.
    rep = lambda shape: pl.BlockSpec(shape, lambda n, r: (0,) * len(shape))

    out_nhwc = pl.pallas_call(
        _bottleneck_kernel,
        out_shape=jax.ShapeDtypeStruct((N, H, W, Cp), jnp.float32),
        grid_spec=pltpu.PrefetchScalarGridSpec(
            num_scalar_prefetch=0,
            grid=(N, R),                         # (image, row tile)
            in_specs=[
                # Full (row-padded) image stays resident across the R row tiles.
                pl.BlockSpec((None, H + 2, W, Cp), lambda n, r: (n, 0, 0, 0)),
                rep((Cp, Wp)), rep((1, Wp)),
                rep((3, 3 * Wp, Wp)), rep((1, Wp)),
                rep((Wp, Cp)), rep((1, Cp)),
            ],
            out_specs=pl.BlockSpec((None, TH, W, Cp), lambda n, r: (n, r, 0, 0)),
            scratch_shapes=[pltpu.VMEM((TH + 2, W, 3 * Wp), jnp.bfloat16)],
        ),
        compiler_params=pltpu.CompilerParams(
            dimension_semantics=("parallel", "parallel"),   # megacore-friendly
            vmem_limit_bytes=48 * 1024 * 1024),             # fits v7x's 64 MiB VMEM
    )(x, packed["w1"], packed["b1"], packed["w2"], packed["b2"],
      packed["w3"], packed["b3"])

    out_nhwc = out_nhwc[..., :Cin]                           # drop channel pad
    return jnp.transpose(out_nhwc, (0, 3, 1, 2))             # NHWC -> NCHW


# ----------------------------------------------------------------------------
# Pure-JAX f32 reference (module semantics, unfolded / unpadded params)
# ----------------------------------------------------------------------------
def reference_forward(x_nchw, params):
    x = jnp.transpose(x_nchw, (0, 2, 3, 1)).astype(jnp.float32)
    t = jnp.einsum("nhwc,cd->nhwd", x, params["w1"])
    t = jnp.maximum(t * params["s1"][0] + params["b1"][0], 0.0)
    t = jax.lax.conv_general_dilated(
        t, params["w2"], window_strides=(1, 1), padding="SAME",
        dimension_numbers=("NHWC", "HWIO", "NHWC"))
    t = jnp.maximum(t * params["s2"][0] + params["b2"][0], 0.0)
    t = jnp.einsum("nhwc,cd->nhwd", t, params["w3"])
    t = t * params["s3"][0] + params["b3"][0]
    t = jnp.maximum(t + x, 0.0)
    return jnp.transpose(t, (0, 3, 1, 2))


# ----------------------------------------------------------------------------
# Deterministic parameter construction (synthetic, no checkpoint load)
# ----------------------------------------------------------------------------
def make_params(key, inplanes, planes, base_width=64, groups=1):
    expansion = 4
    width = int(planes * (base_width / 64.0)) * groups
    cout = planes * expansion
    assert inplanes == cout, "identity add requires downsample=None path"

    ks = jax.random.split(key, 16)
    f32 = jnp.float32

    # conv weights stored as (Cin, Cout) / (kh, kw, Cin, Cout), NHWC-friendly
    w1 = 0.1 * jax.random.normal(ks[0], (inplanes, width), f32)
    w2 = 0.1 * jax.random.normal(ks[1], (3, 3, width, width), f32)
    w3 = 0.1 * jax.random.normal(ks[2], (width, cout), f32)

    def bn(kg, kb, km, kv, c):
        gamma = 1.0 + 0.1 * jax.random.normal(kg, (c,), f32)
        beta = 0.1 * jax.random.normal(kb, (c,), f32)
        mean = 0.1 * jax.random.normal(km, (c,), f32)
        var = jnp.abs(jax.random.normal(kv, (c,), f32)) + 0.5
        return _fold_bn(gamma, beta, mean, var)

    s1, b1 = bn(ks[3], ks[4], ks[5], ks[6], width)
    s2, b2 = bn(ks[7], ks[8], ks[9], ks[10], width)
    s3, b3 = bn(ks[11], ks[12], ks[13], ks[14], cout)

    return dict(w1=w1, s1=s1, b1=b1,
                w2=w2, s2=s2, b2=b2,
                w3=w3, s3=s3, b3=b3)


if __name__ == "__main__":
    # TODO(synk): stride>1 / downsample branch, training-mode (batch-stat)
    # BatchNorm, and the ResNet stem (7x7 conv + maxpool) are not implemented;
    # this kernel covers the standard inference-mode residual Bottleneck block
    # with stride=1 and downsample=None.
    key = jax.random.PRNGKey(0)
    kx, kp = jax.random.split(key)

    N, planes, H, W = 2, 16, 16, 16          # inplanes = planes*4 = 64
    inplanes = planes * 4
    x = jax.random.normal(kx, (N, inplanes, H, W), jnp.float32)
    params = make_params(kp, inplanes, planes)
    packed = pack_params(params)

    out = bottleneck_forward(x, packed)
    out = jax.block_until_ready(out)

    ref = reference_forward(x, params)
    assert out.shape == (N, inplanes, H, W)
    err = jnp.max(jnp.abs(out - ref))
    # bf16 MXU operands / bf16 activations at the HBM boundary (f32 accumulation)
    assert jnp.allclose(out, ref, atol=5e-2, rtol=5e-2), f"max err {err}"

    print("KERNEL_OK")
</pallas_src>

<mosaic_0001>
module attributes {stable_mosaic.version = 11 : i64} {
  func.func @_bottleneck_kernel(%arg0: i32, %arg1: i32, %arg2: memref<1x18x16x128xbf16, #tpu.memory_space<vmem>>, %arg3: memref<128x128xbf16, #tpu.memory_space<vmem>>, %arg4: memref<1x128xf32, #tpu.memory_space<vmem>>, %arg5: memref<3x384x128xbf16, #tpu.memory_space<vmem>>, %arg6: memref<1x128xf32, #tpu.memory_space<vmem>>, %arg7: memref<128x128xbf16, #tpu.memory_space<vmem>>, %arg8: memref<1x128xf32, #tpu.memory_space<vmem>>, %arg9: memref<1x8x16x128xf32, #tpu.memory_space<vmem>>, %arg10: memref<10x16x384xbf16, #tpu.memory_space<vmem>>) attributes {dimension_semantics = [#tpu.dimension_semantics<parallel>, #tpu.dimension_semantics<parallel>], iteration_bounds = array<i64: 2, 2>, scalar_prefetch = 0 : i64, scratch_operands = 1 : i64, tpu.core_type = #tpu.core_type<tc>, window_params = [{transform_indices = @transform_0, window_bounds = array<i64: 1, 18, 16, 128>}, {pipeline_mode = #tpu.pipeline_mode<synchronous>, transform_indices = @transform_1, window_bounds = array<i64: 128, 128>}, {pipeline_mode = #tpu.pipeline_mode<synchronous>, transform_indices = @transform_2, window_bounds = array<i64: 1, 128>}, {pipeline_mode = #tpu.pipeline_mode<synchronous>, transform_indices = @transform_3, window_bounds = array<i64: 3, 384, 128>}, {pipeline_mode = #tpu.pipeline_mode<synchronous>, transform_indices = @transform_4, window_bounds = array<i64: 1, 128>}, {pipeline_mode = #tpu.pipeline_mode<synchronous>, transform_indices = @transform_5, window_bounds = array<i64: 128, 128>}, {pipeline_mode = #tpu.pipeline_mode<synchronous>, transform_indices = @transform_6, window_bounds = array<i64: 1, 128>}, {transform_indices = @transform_7, window_bounds = array<i64: 1, 8, 16, 128>}]} {
    %c8_i32 = arith.constant 8 : i32
    %0 = arith.muli %arg1, %c8_i32 : i32
    %1 = tpu.assume_multiple %0, 8 : i32
    %c0 = arith.constant 0 : index
    %2 = arith.index_cast %1 : i32 to index
    %c0_0 = arith.constant 0 : index
    %c0_1 = arith.constant 0 : index
    %3 = vector.load %arg2[%c0, %2, %c0_0, %c0_1] : memref<1x18x16x128xbf16, #tpu.memory_space<vmem>>, vector<1x10x16x128xbf16>
    %4 = vector.shape_cast %3 : vector<1x10x16x128xbf16> to vector<10x16x128xbf16>
    %5 = vector.shape_cast %4 : vector<10x16x128xbf16> to vector<160x128xbf16>
    %c0_2 = arith.constant 0 : index
    %c0_3 = arith.constant 0 : index
    %6 = vector.load %arg3[%c0_2, %c0_3] : memref<128x128xbf16, #tpu.memory_space<vmem>>, vector<128x128xbf16>
    %cst = arith.constant dense<0.000000e+00> : vector<160x128xf32>
    %7 = tpu.matmul %5, %6, %cst {dimension_numbers = #tpu.dot_dimension_numbers<[1], [0], [0], [1], [0, 0, 1, 1], [], []>} : vector<160x128xbf16>, vector<128x128xbf16>, vector<160x128xf32> -> vector<160x128xf32>
    %c0_4 = arith.constant 0 : index
    %c0_5 = arith.constant 0 : index
    %8 = vector.load %arg4[%c0_4, %c0_5] : memref<1x128xf32, #tpu.memory_space<vmem>>, vector<1x128xf32>
    %9 = vector.broadcast %8 : vector<1x128xf32> to vector<160x128xf32>
    %10 = arith.addf %7, %9 : vector<160x128xf32>
    %cst_6 = arith.constant 0.000000e+00 : f32
    %11 = vector.broadcast %cst_6 : f32 to vector<160x128xf32>
    %12 = arith.maximumf %10, %11 : vector<160x128xf32>
    %13 = vector.shape_cast %12 : vector<160x128xf32> to vector<10x16x128xf32>
    %14 = arith.truncf %13 : vector<10x16x128xf32> to vector<10x16x128xbf16>
    %c0_7 = arith.constant 0 : index
    %c0_8 = arith.constant 0 : index
    %c128 = arith.constant 128 : index
    %15 = vector.load %arg10[%c0_7, %c0_8, %c128] : memref<10x16x384xbf16, #tpu.memory_space<vmem>>, vector<10x16x128xbf16>
    tpu.vector_store %arg10[%c0_7, %c0_8, %c128], %14 {strides = array<i32>} : memref<10x16x384xbf16, #tpu.memory_space<vmem>>, vector<10x16x128xbf16>,
    %16 = vector.extract_strided_slice %14 {offsets = [0, 0, 0], sizes = [10, 15, 128], strides = [1, 1, 1]} : vector<10x16x128xbf16> to vector<10x15x128xbf16>
    %c0_9 = arith.constant 0 : index
    %c1 = arith.constant 1 : index
    %c0_10 = arith.constant 0 : index
    %17 = vector.load %arg10[%c0_9, %c1, %c0_10] : memref<10x16x384xbf16, #tpu.memory_space<vmem>>, vector<10x15x128xbf16>
    tpu.vector_store %arg10[%c0_9, %c1, %c0_10], %16 {strides = array<i32>} : memref<10x16x384xbf16, #tpu.memory_space<vmem>>, vector<10x15x128xbf16>,
    %18 = vector.extract_strided_slice %14 {offsets = [0, 1, 0], sizes = [10, 15, 128], strides = [1, 1, 1]} : vector<10x16x128xbf16> to vector<10x15x128xbf16>
    %c0_11 = arith.constant 0 : index
    %c0_12 = arith.constant 0 : index
    %c256 = arith.constant 256 : index
    %19 = vector.load %arg10[%c0_11, %c0_12, %c256] : memref<10x16x384xbf16, #tpu.memory_space<vmem>>, vector<10x15x128xbf16>
    tpu.vector_store %arg10[%c0_11, %c0_12, %c256], %18 {strides = array<i32>} : memref<10x16x384xbf16, #tpu.memory_space<vmem>>, vector<10x15x128xbf16>,
    %cst_13 = arith.constant 0.000000e+00 : bf16
    %20 = vector.broadcast %cst_13 : bf16 to vector<10x1x128xbf16>
    %c0_14 = arith.constant 0 : index
    %c0_15 = arith.constant 0 : index
    %c0_16 = arith.constant 0 : index
    %21 = vector.load %arg10[%c0_14, %c0_15, %c0_16] : memref<10x16x384xbf16, #tpu.memory_space<vmem>>, vector<10x1x128xbf16>
    tpu.vector_store %arg10[%c0_14, %c0_15, %c0_16], %20 {strides = array<i32>} : memref<10x16x384xbf16, #tpu.memory_space<vmem>>, vector<10x1x128xbf16>,
    %cst_17 = arith.constant 0.000000e+00 : bf16
    %22 = vector.broadcast %cst_17 : bf16 to vector<10x1x128xbf16>
    %c0_18 = arith.constant 0 : index
    %c15 = arith.constant 15 : index
    %c256_19 = arith.constant 256 : index
    %23 = vector.load %arg10[%c0_18, %c15, %c256_19] : memref<10x16x384xbf16, #tpu.memory_space<vmem>>, vector<10x1x128xbf16>
    tpu.vector_store %arg10[%c0_18, %c15, %c256_19], %22 {strides = array<i32>} : memref<10x16x384xbf16, #tpu.memory_space<vmem>>, vector<10x1x128xbf16>,
    %c0_i32 = arith.constant 0 : i32
    %24 = arith.cmpi eq, %arg1, %c0_i32 : i32
    %25 = arith.extui %24 : i1 to i32
    %c0_i32_20 = arith.constant 0 : i32
    %26 = arith.cmpi ne, %25, %c0_i32_20 : i32
    scf.if %26 {
      %cst_59 = arith.constant 0.000000e+00 : bf16
      %71 = vector.broadcast %cst_59 : bf16 to vector<1x16x384xbf16>
      %c0_60 = arith.constant 0 : index
      %c0_61 = arith.constant 0 : index
      %c0_62 = arith.constant 0 : index
      %72 = vector.load %arg10[%c0_60, %c0_61, %c0_62] : memref<10x16x384xbf16, #tpu.memory_space<vmem>>, vector<1x16x384xbf16>
      tpu.vector_store %arg10[%c0_60, %c0_61, %c0_62], %71 {strides = array<i32>} : memref<10x16x384xbf16, #tpu.memory_space<vmem>>, vector<1x16x384xbf16>,
    } else {
    }
    %c1_i32 = arith.constant 1 : i32
    %27 = arith.cmpi eq, %arg1, %c1_i32 : i32
    %28 = arith.extui %27 : i1 to i32
    %c0_i32_21 = arith.constant 0 : i32
    %29 = arith.cmpi ne, %28, %c0_i32_21 : i32
    scf.if %29 {
      %cst_59 = arith.constant 0.000000e+00 : bf16
      %71 = vector.broadcast %cst_59 : bf16 to vector<1x16x384xbf16>
      %c9 = arith.constant 9 : index
      %c0_60 = arith.constant 0 : index
      %c0_61 = arith.constant 0 : index
      %72 = vector.load %arg10[%c9, %c0_60, %c0_61] : memref<10x16x384xbf16, #tpu.memory_space<vmem>>, vector<1x16x384xbf16>
      tpu.vector_store %arg10[%c9, %c0_60, %c0_61], %71 {strides = array<i32>} : memref<10x16x384xbf16, #tpu.memory_space<vmem>>, vector<1x16x384xbf16>,
    } else {
    }
    %c0_22 = arith.constant 0 : index
    %c0_23 = arith.constant 0 : index
    %c0_24 = arith.constant 0 : index
    %30 = vector.load %arg10[%c0_22, %c0_23, %c0_24] : memref<10x16x384xbf16, #tpu.memory_space<vmem>>, vector<8x16x384xbf16>
    %31 = vector.shape_cast %30 : vector<8x16x384xbf16> to vector<128x384xbf16>
    %c0_25 = arith.constant 0 : index
    %c0_26 = arith.constant 0 : index
    %c0_27 = arith.constant 0 : index
    %32 = vector.load %arg5[%c0_25, %c0_26, %c0_27] : memref<3x384x128xbf16, #tpu.memory_space<vmem>>, vector<1x384x128xbf16>
    %33 = vector.shape_cast %32 : vector<1x384x128xbf16> to vector<384x128xbf16>
    %cst_28 = arith.constant dense<0.000000e+00> : vector<128x128xf32>
    %34 = tpu.matmul %31, %33, %cst_28 {dimension_numbers = #tpu.dot_dimension_numbers<[1], [0], [0], [1], [0, 0, 1, 1], [], []>} : vector<128x384xbf16>, vector<384x128xbf16>, vector<128x128xf32> -> vector<128x128xf32>
    %c1_29 = arith.constant 1 : index
    %c0_30 = arith.constant 0 : index
    %c0_31 = arith.constant 0 : index
    %35 = vector.load %arg10[%c1_29, %c0_30, %c0_31] : memref<10x16x384xbf16, #tpu.memory_space<vmem>>, vector<8x16x384xbf16>
    %36 = vector.shape_cast %35 : vector<8x16x384xbf16> to vector<128x384xbf16>
    %c1_32 = arith.constant 1 : index
    %c0_33 = arith.constant 0 : index
    %c0_34 = arith.constant 0 : index
    %37 = vector.load %arg5[%c1_32, %c0_33, %c0_34] : memref<3x384x128xbf16, #tpu.memory_space<vmem>>, vector<1x384x128xbf16>
    %38 = vector.shape_cast %37 : vector<1x384x128xbf16> to vector<384x128xbf16>
    %cst_35 = arith.constant dense<0.000000e+00> : vector<128x128xf32>
    %39 = tpu.matmul %36, %38, %cst_35 {dimension_numbers = #tpu.dot_dimension_numbers<[1], [0], [0], [1], [0, 0, 1, 1], [], []>} : vector<128x384xbf16>, vector<384x128xbf16>, vector<128x128xf32> -> vector<128x128xf32>
    %40 = arith.addf %34, %39 : vector<128x128xf32>
    %c2 = arith.constant 2 : index
    %c0_36 = arith.constant 0 : index
    %c0_37 = arith.constant 0 : index
    %41 = vector.load %arg10[%c2, %c0_36, %c0_37] : memref<10x16x384xbf16, #tpu.memory_space<vmem>>, vector<8x16x384xbf16>
    %42 = vector.shape_cast %41 : vector<8x16x384xbf16> to vector<128x384xbf16>
    %c2_38 = arith.constant 2 : index
    %c0_39 = arith.constant 0 : index
    %c0_40 = arith.constant 0 : index
    %43 = vector.load %arg5[%c2_38, %c0_39, %c0_40] : memref<3x384x128xbf16, #tpu.memory_space<vmem>>, vector<1x384x128xbf16>
    %44 = vector.shape_cast %43 : vector<1x384x128xbf16> to vector<384x128xbf16>
    %cst_41 = arith.constant dense<0.000000e+00> : vector<128x128xf32>
    %45 = tpu.matmul %42, %44, %cst_41 {dimension_numbers = #tpu.dot_dimension_numbers<[1], [0], [0], [1], [0, 0, 1, 1], [], []>} : vector<128x384xbf16>, vector<384x128xbf16>, vector<128x128xf32> -> vector<128x128xf32>
    %46 = arith.addf %40, %45 : vector<128x128xf32>
    %c0_42 = arith.constant 0 : index
    %c0_43 = arith.constant 0 : index
    %47 = vector.load %arg6[%c0_42, %c0_43] : memref<1x128xf32, #tpu.memory_space<vmem>>, vector<1x128xf32>
    %48 = vector.broadcast %47 : vector<1x128xf32> to vector<128x128xf32>
    %49 = arith.addf %46, %48 : vector<128x128xf32>
    %cst_44 = arith.constant 0.000000e+00 : f32
    %50 = vector.broadcast %cst_44 : f32 to vector<128x128xf32>
    %51 = arith.maximumf %49, %50 : vector<128x128xf32>
    %52 = arith.truncf %51 : vector<128x128xf32> to vector<128x128xbf16>
    %c0_45 = arith.constant 0 : index
    %c0_46 = arith.constant 0 : index
    %53 = vector.load %arg7[%c0_45, %c0_46] : memref<128x128xbf16, #tpu.memory_space<vmem>>, vector<128x128xbf16>
    %cst_47 = arith.constant dense<0.000000e+00> : vector<128x128xf32>
    %54 = tpu.matmul %52, %53, %cst_47 {dimension_numbers = #tpu.dot_dimension_numbers<[1], [0], [0], [1], [0, 0, 1, 1], [], []>} : vector<128x128xbf16>, vector<128x128xbf16>, vector<128x128xf32> -> vector<128x128xf32>
    %c1_i32_48 = arith.constant 1 : i32
    %55 = arith.addi %1, %c1_i32_48 : i32
    %c0_49 = arith.constant 0 : index
    %56 = arith.index_cast %55 : i32 to index
    %c0_50 = arith.constant 0 : index
    %c0_51 = arith.constant 0 : index
    %57 = vector.load %arg2[%c0_49, %56, %c0_50, %c0_51] : memref<1x18x16x128xbf16, #tpu.memory_space<vmem>>, vector<1x8x16x128xbf16>
    %58 = vector.shape_cast %57 : vector<1x8x16x128xbf16> to vector<8x16x128xbf16>
    %59 = vector.shape_cast %58 : vector<8x16x128xbf16> to vector<128x128xbf16>
    %60 = arith.extf %59 : vector<128x128xbf16> to vector<128x128xf32>
    %c0_52 = arith.constant 0 : index
    %c0_53 = arith.constant 0 : index
    %61 = vector.load %arg8[%c0_52, %c0_53] : memref<1x128xf32, #tpu.memory_space<vmem>>, vector<1x128xf32>
    %62 = vector.broadcast %61 : vector<1x128xf32> to vector<128x128xf32>
    %63 = arith.addf %54, %62 : vector<128x128xf32>
    %64 = arith.addf %63, %60 : vector<128x128xf32>
    %cst_54 = arith.constant 0.000000e+00 : f32
    %65 = vector.broadcast %cst_54 : f32 to vector<128x128xf32>
    %66 = arith.maximumf %64, %65 : vector<128x128xf32>
    %67 = vector.shape_cast %66 : vector<128x128xf32> to vector<8x16x128xf32>
    %c0_55 = arith.constant 0 : index
    %c0_56 = arith.constant 0 : index
    %c0_57 = arith.constant 0 : index
    %c0_58 = arith.constant 0 : index
    %68 = vector.load %arg9[%c0_55, %c0_56, %c0_57, %c0_58] : memref<1x8x16x128xf32, #tpu.memory_space<vmem>>, vector<1x8x16x128xf32>
    %69 = vector.shape_cast %68 : vector<1x8x16x128xf32> to vector<8x16x128xf32>
    %70 = vector.shape_cast %67 : vector<8x16x128xf32> to vector<1x8x16x128xf32>
    tpu.vector_store %arg9[%c0_55, %c0_56, %c0_57, %c0_58], %70 {strides = array<i32>} : memref<1x8x16x128xf32, #tpu.memory_space<vmem>>, vector<1x8x16x128xf32>,
    return
  }
  func.func @transform_0(%arg0: i32, %arg1: i32) -> (i32, i32, i32, i32) {
    %c0_i32 = arith.constant 0 : i32
    %c0_i32_0 = arith.constant 0 : i32
    %c0_i32_1 = arith.constant 0 : i32
    %c0_i32_2 = arith.constant 0 : i32
    return %arg0, %c0_i32, %c0_i32_0, %c0_i32_1 : i32, i32, i32, i32
  }
  func.func @transform_1(%arg0: i32, %arg1: i32) -> (i32, i32) {
    %c0_i32 = arith.constant 0 : i32
    %c0_i32_0 = arith.constant 0 : i32
    %c0_i32_1 = arith.constant 0 : i32
    return %c0_i32, %c0_i32_0 : i32, i32
  }
  func.func @transform_2(%arg0: i32, %arg1: i32) -> (i32, i32) {
    %c0_i32 = arith.constant 0 : i32
    %c0_i32_0 = arith.constant 0 : i32
    %c0_i32_1 = arith.constant 0 : i32
    return %c0_i32, %c0_i32_0 : i32, i32
  }
  func.func @transform_3(%arg0: i32, %arg1: i32) -> (i32, i32, i32) {
    %c0_i32 = arith.constant 0 : i32
    %c0_i32_0 = arith.constant 0 : i32
    %c0_i32_1 = arith.constant 0 : i32
    %c0_i32_2 = arith.constant 0 : i32
    return %c0_i32, %c0_i32_0, %c0_i32_1 : i32, i32, i32
  }
  func.func @transform_4(%arg0: i32, %arg1: i32) -> (i32, i32) {
    %c0_i32 = arith.constant 0 : i32
    %c0_i32_0 = arith.constant 0 : i32
    %c0_i32_1 = arith.constant 0 : i32
    return %c0_i32, %c0_i32_0 : i32, i32
  }
  func.func @transform_5(%arg0: i32, %arg1: i32) -> (i32, i32) {
    %c0_i32 = arith.constant 0 : i32
    %c0_i32_0 = arith.constant 0 : i32
    %c0_i32_1 = arith.constant 0 : i32
    return %c0_i32, %c0_i32_0 : i32, i32
  }
  func.func @transform_6(%arg0: i32, %arg1: i32) -> (i32, i32) {
    %c0_i32 = arith.constant 0 : i32
    %c0_i32_0 = arith.constant 0 : i32
    %c0_i32_1 = arith.constant 0 : i32
    return %c0_i32, %c0_i32_0 : i32, i32
  }
  func.func @transform_7(%arg0: i32, %arg1: i32) -> (i32, i32, i32, i32) {
    %c0_i32 = arith.constant 0 : i32
    %c0_i32_0 = arith.constant 0 : i32
    %c0_i32_1 = arith.constant 0 : i32
    return %arg0, %arg1, %c0_i32, %c0_i32_0 : i32, i32, i32, i32
  }
}

</mosaic_0001>

<bundles_post_ra>
// kernel: bottleneck_forward.1
= control target key start
LH: loop header
LB: loop body
LE: loop exit
PB: predicated region body
PF: predicated region fallthrough
CT: control target
= control target key end

     0   :  { %s3546_s24 = smov 0   ;;  %s3548_s25 = smov 0   ;;  %s4282_s0 = inlined_call_operand.vmem [shape: bf16[2,18,16,128], index: 0, kind: input, shape index: {}]   ;;  %s4283_s1 = inlined_call_operand.vmem [shape: bf16[128,128], index: 1, kind: input, shape index: {}]   ;;  %s4284_s2 = inlined_call_operand.vmem [shape: f32[1,128], index: 2, kind: input, shape index: {}]   ;;  %s4285_s3 = inlined_call_operand.vmem [shape: bf16[3,384,128], index: 3, kind: input, shape index: {}]   ;;  %s4286_s4 = inlined_call_operand.vmem [shape: f32[1,128], index: 4, kind: input, shape index: {}]   ;;  %s4287_s5 = inlined_call_operand.vmem [shape: bf16[128,128], index: 5, kind: input, shape index: {}]   ;;  %s4288_s6 = inlined_call_operand.vmem [shape: f32[1,128], index: 6, kind: input, shape index: {}]   ;;  %s4289_s7 = inlined_call_operand.vmem [shape: f32[2,16,16,128], index: 7, kind: output, shape index: {}]  }
   0x1   :  { %s3550_s26 = smov 0   ;;  %s3552_s27 = smov 0  }
   0x2   :  { %s3554_s28 = smov 0  }
   0x3 LB: > { %s26_s29 = sadd.s32 1, %s3494_s26  ;;  %s29_s30 = sadd.s32 1, %s3498_s27  ;;  %s3502_s28 = sphi %s3554_s28, %s17_s28   ;;  %s3498_s27 = sphi %s3552_s27, %s4301_s27   ;;  %s3494_s26 = sphi %s3550_s26, %s4300_s26   ;;  %s3490_s25 = sphi %s3548_s25, %s4299_s25   ;;  %s3486_s24 = sphi %s3546_s24, %s4298_s24  }
   0x4   : > { %p27_p0 = scmp.ge.s32.totalorder %s26_s29, 2  ;;  %p2518_p1 = scmp.ge.s32.totalorder %s3502_s28, 1 }
   0x5   : > { %p251_p2 = scmp.lt.s32.totalorder %s3502_s28, 5 }
   0x6   : > { %s4303_s29 = smov (%p27_p0, %s26_s29), 0  ;;  %s4305_s30 = smov (!%p27_p0, %s29_s30), %s3498_s27 }
   0x7   : > { %p252_p3 = pnand %p2518_p1, %p251_p2  ;;  %p31_p4 = scmp.ge.s32.totalorder %s4305_s30, 2 }
   0x8   : > { %v3366_v0 = vld [vmem:[%s4283_s1] sm:$0xff] (!%p252_p3)   ;;  %p288_p5 = scmp.lt.s32.totalorder (!%p252_p3), %s3490_s25, 1  ;;  %v3367_v1 = vld [vmem:[%s4283_s1 + $0x8] sm:$0xff] (!%p252_p3)   ;;  %s2520_s12 = sshll.u32 (!%p252_p3), %s3486_s24, 3  ;;  %v3368_v2 = vld [vmem:[%s4283_s1 + $0x10] sm:$0xff] (!%p252_p3)   ;;  %vm693_vm0 = vcmask (!%p252_p3), 1047552  }
   0x9   : > { %s4307_s30 = smov (%p31_p4, %s4305_s30), 0  ;;  %255 = sbr.rel (%p252_p3) target bundleno = 952 (0x3b8), region = 48 }
   0xa   : > { %3063 = vmatprep.subr.bf16.mxu0 (!%p252_p3), %v3366_v0  ;;  %3227 = vmatprep.subr.bf16.mxu1 (!%p252_p3), %v3366_v0  ;;  %p296_p6 = scmp.lt.s32.totalorder (!%p252_p3), %s2520_s12, 15  ;;  %v3369_v3 = vld [vmem:[%s4283_s1 + $0x18] sm:$0xff] (!%p252_p3)   ;;  %s2747_s8 = sshll.u32 (!%p252_p3), %s3486_s24, 6  ;;  %v3370_v5 = vld [vmem:[%s4283_s1 + $0x20] sm:$0xff] (!%p252_p3)   ;;  %v3371_v6 = vld [vmem:[%s4283_s1 + $0x28] sm:$0xff] (!%p252_p3)   ;;  %vm788_vm3 = vcmask (!%p252_p3), 1040384  }
   0xb   : > { %3064 = vmatpush3.bf16.msra.mxu0 (!%p252_p3), %v3366_v0  ;;  %3235 = vmatpush3.bf16.msra.mxu1 (!%p252_p3), %v3366_v0  ;;  %v3372_v8 = vld [vmem:[%s4283_s1 + $0x30] sm:$0xff] (!%p252_p3)   ;;  %v3373_v9 = vld [vmem:[%s4283_s1 + $0x38] sm:$0xff] (!%p252_p3)   ;;  %v3627_v18 = vld [vmem:[%s4284_s2] ss:$0 sm:$0xff] (!%p252_p3)  ;;  %vm694_vm1 = vsmask.f32 (!%p252_p3), 7938 }
   0xc   : > { %3065 = vmatprep.subr.bf16.mxu0 (!%p252_p3), %v3367_v1  ;;  %3228 = vmatprep.subr.bf16.mxu1 (!%p252_p3), %v3367_v1  ;;  %vm756_vm2 = vsmask.f32 (!%p252_p3), 7424  ;;  %vm789_vm4 = vsmask.f32 (!%p252_p3), 256  ;;  %vm821_vm5 = vcmask (!%p252_p3), 1047559   ;;  %vm3644_vm7 = vmand (!%p252_p3), %vm693_vm0, %vm694_vm1  ;;  %v699_v0 = vld [vmem:[#allocation2 + $0x18] sm:$0xff] (!%p252_p3) }
   0xd   : > { %vm822_vm6 = vsmask.f32 (!%p252_p3), 7966  ;;  %vm3651_vm8 = vmand (!%p252_p3), %vm693_vm0, %vm756_vm2  ;;  %p2546_p7 = scmp.ne.s32.totalorder (!%p252_p3), %s3486_s24, 0 }
   0xe   : > { %vm3673_vm9 = vmand (!%p252_p3), %vm788_vm3, %vm789_vm4 }
   0xf   : > { %3066 = vmatpush3.bf16.msra.mxu0 (!%p252_p3), %v3367_v1  ;;  %3236 = vmatpush3.bf16.msra.mxu1 (!%p252_p3), %v3367_v1  ;;  %vm3680_vm10 = vmand (!%p252_p3), %vm821_vm5, %vm822_vm6 }
  0x10   : > { %s4309_s25 = smov (!%p288_p5, %s3490_s25), 1  ;;  %s4311_s12 = smov (!%p296_p6, %s2520_s12), 15  ;;  %3067 = vmatprep.subr.bf16.mxu0 %v3368_v2  ;;  %3229 = vmatprep.subr.bf16.mxu1 %v3368_v2 }
  0x11   : > { %s3323_s15 = smul.u32 144, %s4309_s25  ;;  %s2522_s19 = sshll.u32 %s4309_s25, 5 }
  0x12   : > { %s2521_s20 = sshll.u32 %s4311_s12, 1 }
  0x13   : > { %s292_s18 = scalar_lea.vmem %s4282_s0, %s3323_s15  ;;  %s300_s23 = sadd.s32 %s2522_s19, %s2521_s20  ;;  %3068 = vmatpush3.bf16.msra.mxu0 %v3368_v2  ;;  %3237 = vmatpush3.bf16.msra.mxu1 %v3368_v2  ;;  %v761_v2 = vld [vmem:[#allocation2 + $0x28] sm:$0xff] }
  0x14   : > { %s2523_s9 = sshll.u32 %s300_s23, 3  ;;  %s3595_s10 = scalar_lea.vmem %s292_s18, %s2747_s8  ;;  %3069 = vmatprep.subr.bf16.mxu0 %v3369_v3  ;;  %3230 = vmatprep.subr.bf16.mxu1 %v3369_v3 }
  0x15   : > { %s3600_s25 = scalar_lea.vmem %s4289_s7, %s2523_s9  ;;  %v3374_v4 = vld [vmem:[%s3595_s10] sm:$0xff]   ;;  %v3375_v10 = vld [vmem:[%s3595_s10 + $0x8] sm:$0xff]   ;;  %v3376_v12 = vld [vmem:[%s3595_s10 + $0x10] sm:$0xff]  }
  0x16   : > { %3079 = vmatprep.mubr.bf16.mxu0 %v3374_v4  ;;  %v3380_v7 = vld [vmem:[%s3595_s10 + $0x40] sm:$0xff]   ;;  %v3381_v11 = vld [vmem:[%s3595_s10 + $0x48] sm:$0xff]   ;;  %v3377_v13 = vld [vmem:[%s3595_s10 + $0x18] sm:$0xff]  }
  0x17   : > { %3070 = vmatpush3.bf16.msra.mxu0 %v3369_v3  ;;  %3238 = vmatpush3.bf16.msra.mxu1 %v3369_v3  ;;  %v3378_v14 = vld [vmem:[%s3595_s10 + $0x20] sm:$0xff]   ;;  %v3379_v15 = vld [vmem:[%s3595_s10 + $0x28] sm:$0xff]   ;;  %v3382_v16 = vld [vmem:[%s3595_s10 + $0x30] sm:$0xff]  }
  0x18   : > { %3071 = vmatprep.subr.bf16.mxu0 %v3370_v5  ;;  %3231 = vmatprep.subr.bf16.mxu1 %v3370_v5  ;;  %v3383_v17 = vld [vmem:[%s3595_s10 + $0x38] sm:$0xff]  }
  0x19   : > { %3095 = vmatprep.mubr.bf16.mxu1 %v3380_v7 }
  0x1b   : > { %3072 = vmatpush3.bf16.msra.mxu0 %v3370_v5  ;;  %3239 = vmatpush3.bf16.msra.mxu1 %v3370_v5 }
  0x1c   : > { %3073 = vmatprep.subr.bf16.mxu0 %v3371_v6  ;;  %3232 = vmatprep.subr.bf16.mxu1 %v3371_v6 }
  0x1f   : > { %3074 = vmatpush3.bf16.msra.mxu0 %v3371_v6  ;;  %3240 = vmatpush3.bf16.msra.mxu1 %v3371_v6 }
  0x20   : > { %3075 = vmatprep.subr.bf16.mxu0 %v3372_v8  ;;  %3233 = vmatprep.subr.bf16.mxu1 %v3372_v8 }
  0x23   : > { %3076 = vmatpush3.bf16.msra.mxu0 %v3372_v8  ;;  %3241 = vmatpush3.bf16.msra.mxu1 %v3372_v8 }
  0x24   : > { %3077 = vmatprep.subr.bf16.mxu0 %v3373_v9  ;;  %3234 = vmatprep.subr.bf16.mxu1 %v3373_v9 }
  0x27   : > { %3078 = vmatpush3.bf16.msra.mxu0 %v3373_v9  ;;  %3242 = vmatpush3.bf16.msra.mxu1 %v3373_v9  ;;  %v696_v9 = vld [vmem:[#allocation2] sm:$0xff] }
  0x2a   : > { %3080 = vmatmul.mubr.bf16.vlgmr.msra.gmra.mrb[0].mxu0 %v3375_v10  ;;  %3096 = vmatmul.mubr.bf16.vlgmr.msra.gmra.mrb[0].mxu1 %v3381_v11  ;;  %v758_v10 = vld [vmem:[#allocation2 + $0x10] sm:$0xff] }
  0x2b   : > { %3083 = vmatprep.mubr.bf16.mxu0 %v3376_v12 }
  0x32   : > { %3084 = vmatmul.mubr.bf16.gmra.mrb[4].mxu0 %v3377_v13 }
  0x33   : > { %3087 = vmatprep.mubr.bf16.mxu0 %v3378_v14 }
  0x3a   : > { %3088 = vmatmul.mubr.bf16.gmra.mrb[8].mxu0 %v3379_v15 }
  0x3b   : > { %3091 = vmatprep.mubr.bf16.mxu0 %v3382_v16  ;;  %v723_v16 = vld [vmem:[#allocation2 + $0xd8] sm:$0xff] }
  0x42   : > { %3092 = vmatmul.mubr.bf16.gmra.mrb[12].mxu0 %v3383_v17 }
  0xfd   : > { %v3081_v19 = vpop.f32.mrb[0].mxu0  ;;  %v3097_v20 = vpop.f32.mrb[0].mxu1 }
  0xfe   : > { %v503_v21 = vadd.f32 %v3081_v19, %v3627_v18  ;;  %v494_v22 = vpop.f32.mrb[1].mxu0  ;;  %v567_v23 = vadd.f32 %v3097_v20, %v3627_v18  ;;  %v558_v24 = vpop.f32.mrb[1].mxu1 }
  0xff   : > { %v495_v25 = vadd.f32 %v3627_v18, %v494_v22  ;;  %v3082_v26 = vpop.f32.mrb[2].mxu0  ;;  %v559_v27 = vadd.f32 %v3627_v18, %v558_v24  ;;  %v3098_v28 = vpop.f32.mrb[2].mxu1 }
 0x100   : > { %v506_v29 = vadd.f32 %v3082_v26, %v3627_v18  ;;  %v497_v30 = vpop.f32.mrb[3].mxu0  ;;  %v591_v31 = vmax.f32 %v567_v23, 0.0  ;;  %v570_v32 = vadd.f32 %v3098_v28, %v3627_v18  ;;  %v561_v33 = vpop.f32.mrb[3].mxu1  ;;  %v575_v37 = vmax.f32 %v503_v21, 0.0  ;;  %v785_v23 = vld [vmem:[#allocation2 + $0xe8] sm:$0xff] }
 0x101   : > { %v498_v34 = vadd.f32 %v3627_v18, %v497_v30  ;;  %v589_v35 = vmax.f32 %v559_v27, 0.0  ;;  %v562_v36 = vadd.f32 %v3627_v18, %v561_v33  ;;  %v573_v40 = vmax.f32 %v495_v25, 0.0 }
 0x102   : > { %v576_v38 = vmax.f32 %v506_v29, 0.0  ;;  %v592_v39 = vmax.f32 %v570_v32, 0.0 }
 0x103   : > { %v574_v41 = vmax.f32 %v498_v34, 0.0  ;;  %v590_v42 = vmax.f32 %v562_v36, 0.0 }
 0x104   : > { %v594_v43 = vpack.c.bf16 %v576_v38, %v575_v37  ;;  %v602_v44 = vpack.c.bf16 %v592_v39, %v591_v31 }
 0x105   : > { %v593_v45 = vpack.c.bf16 %v574_v41, %v573_v40  ;;  %v3085_v46 = vpop.f32.mrb[4].mxu0  ;;  %v3637_v47 = vpack.c.bf16 %v590_v42, %v589_v35 }
 0x106   : > { %604 = vst [vmem:[#allocation2 + $0x20] sm:$0xff] %v594_v43  ;;  %v621_v48 = vshrl.u32 %v594_v43, 16  ;;  %v624_v49 = vshll.u32 %v594_v43, 16  ;;  %v519_v50 = vadd.f32 %v3085_v46, %v3627_v18  ;;  %v510_v51 = vpop.f32.mrb[5].mxu0  ;;  %612 = vst [vmem:[#allocation2 + $0xe0] sm:$0xff] %v602_v44  ;;  %v677_v52 = vshrl.u32 %v602_v44, 16 }
 0x107   : > { %603 = vst [vmem:[#allocation2 + $0x8] sm:$0xff] %v593_v45  ;;  %v614_v53 = vshrl.u32 %v593_v45, 16  ;;  %v617_v54 = vshll.u32 %v593_v45, 16  ;;  %v511_v55 = vadd.f32 %v3627_v18, %v510_v51  ;;  %v3086_v56 = vpop.f32.mrb[6].mxu0  ;;  %v680_v57 = vshll.u32 %v602_v44, 16  ;;  %611 = vst [vmem:[#allocation2 + $0xc8] sm:$0xff] %v3637_v47 }
 0x108   : > { %v623_v58 = vrot.slane %v621_v48, 7  ;;  %v728_v60 = vrot.slane %v624_v49, 1  ;;  %v579_v61 = vmax.f32 %v519_v50, 0.0  ;;  %v522_v62 = vadd.f32 %v3086_v56, %v3627_v18  ;;  %v513_v63 = vpop.f32.mrb[7].mxu0  ;;  %v705_v45 = vld [vmem:[#allocation2 + $0x48] sm:$0xff]  ;;  %v767_v46 = vld [vmem:[#allocation2 + $0x58] sm:$0xff] }
 0x109   : > { %v616_v3 = vrot.slane %v614_v53, 7  ;;  %v726_v4 = vrot.slane %v617_v54, 1  ;;  %v577_v5 = vmax.f32 %v511_v55, 0.0  ;;  %v514_v6 = vadd.f32 %v3627_v18, %v513_v63  ;;  %v702_v55 = vld [vmem:[#allocation2 + $0x30] sm:$0xff]  ;;  %v764_v56 = vld [vmem:[#allocation2 + $0x40] sm:$0xff] }
 0x10a   : > { %v626_v7 = vor.u32 %v624_v49, %v623_v58  ;;  %v729_v8 = vor.u32 %v728_v60, %v621_v48  ;;  %v580_v11 = vmax.f32 %v522_v62, 0.0  ;;  %v679_v12 = vrot.slane %v677_v52, 7 }
 0x10b   : > { %v619_v13 = vor.u32 %v617_v54, %v616_v3  ;;  %v727_v14 = vor.u32 %v726_v4, %v614_v53  ;;  %v578_v15 = vmax.f32 %v514_v6, 0.0  ;;  %v744_v17 = vrot.slane %v680_v57, 1 }
 0x10c   : > { %v700_v19 = vsel %vm3644_vm7, %v626_v7, %v699_v0  ;;  %v762_v20 = vsel %vm3651_vm8, %v729_v8, %v761_v2  ;;  %v596_v21 = vpack.c.bf16 %v580_v11, %v579_v61  ;;  %v682_v22 = vor.u32 %v680_v57, %v679_v12  ;;  %v720_v7 = vld [vmem:[#allocation2 + $0xc0] sm:$0xff] }
 0x10d   : > { %701 = vst [vmem:[#allocation2 + $0x18] sm:$0xff] %v700_v19  ;;  %763 = vst [vmem:[#allocation2 + $0x28] sm:$0xff] %v762_v20  ;;  %v697_v24 = vsel %vm3644_vm7, %v619_v13, %v696_v9  ;;  %v759_v25 = vsel %vm3651_vm8, %v727_v14, %v758_v10  ;;  %v595_v26 = vpack.c.bf16 %v578_v15, %v577_v5  ;;  %v3089_v27 = vpop.f32.mrb[8].mxu0  ;;  %v670_v58 = vshrl.u32 %v3637_v47, 16 }
 0x10e   : > { %v745_v28 = vor.u32 %v744_v17, %v677_v52  ;;  %698 = vst [vmem:[#allocation2] sm:$0xff] %v697_v24  ;;  %760 = vst [vmem:[#allocation2 + $0x10] sm:$0xff] %v759_v25  ;;  %v635_v29 = vshrl.u32 %v596_v21, 16  ;;  %v638_v30 = vshll.u32 %v596_v21, 16  ;;  %v535_v31 = vadd.f32 %v3089_v27, %v3627_v18  ;;  %v526_v32 = vpop.f32.mrb[9].mxu0 }
 0x10f   : > { %606 = vst [vmem:[#allocation2 + $0x50] sm:$0xff] %v596_v21  ;;  %v724_v33 = vsel %vm3644_vm7, %v682_v22, %v723_v16  ;;  %605 = vst [vmem:[#allocation2 + $0x38] sm:$0xff] %v595_v26  ;;  %v628_v34 = vshrl.u32 %v595_v26, 16  ;;  %v631_v35 = vshll.u32 %v595_v26, 16  ;;  %v527_v36 = vadd.f32 %v3627_v18, %v526_v32  ;;  %v3090_v37 = vpop.f32.mrb[10].mxu0  ;;  %v773_v32 = vld [vmem:[#allocation2 + $0x88] sm:$0xff] }
 0x110   : > { %725 = vst [vmem:[#allocation2 + $0xd8] sm:$0xff] %v724_v33  ;;  %v786_v38 = vsel %vm3651_vm8, %v745_v28, %v785_v23  ;;  %v637_v39 = vrot.slane %v635_v29, 7  ;;  %v732_v40 = vrot.slane %v638_v30, 1  ;;  %v583_v41 = vmax.f32 %v535_v31, 0.0  ;;  %v529_v43 = vpop.f32.mrb[11].mxu0  ;;  %v782_v28 = vld [vmem:[#allocation2 + $0xd0] sm:$0xff] }
 0x111   : > { %v538_v42 = vadd.f32 %v3090_v37, %v3627_v18  ;;  %787 = vst [vmem:[#allocation2 + $0xe8] sm:$0xff] %v786_v38  ;;  %v630_v48 = vrot.slane %v628_v34, 7  ;;  %v730_v49 = vrot.slane %v631_v35, 1  ;;  %v581_v50 = vmax.f32 %v527_v36, 0.0  ;;  %v711_v31 = vld [vmem:[#allocation2 + $0x78] sm:$0xff] }
 0x112   : > { %v530_v51 = vadd.f32 %v3627_v18, %v529_v43  ;;  %v640_v53 = vor.u32 %v638_v30, %v637_v39  ;;  %v733_v54 = vor.u32 %v732_v40, %v635_v29  ;;  %v673_v63 = vshll.u32 %v3637_v47, 16 }
 0x113   : > { %v584_v57 = vmax.f32 %v538_v42, 0.0  ;;  %v633_v60 = vor.u32 %v631_v35, %v630_v48  ;;  %v731_v61 = vor.u32 %v730_v49, %v628_v34  ;;  %v672_v6 = vrot.slane %v670_v58, 7 }
 0x114   : > { %v582_v62 = vmax.f32 %v530_v51, 0.0  ;;  %v794_v0 = vld [vmem:[#allocation2 + $0x18] sm:$0x1]  ;;  %v827_v2 = vld [vmem:[#allocation2 + $0x28] sm:$0x80]  ;;  %v706_v3 = vsel %vm3644_vm7, %v640_v53, %v705_v45  ;;  %v768_v4 = vsel %vm3651_vm8, %v733_v54, %v767_v46  ;;  %v742_v23 = vrot.slane %v673_v63, 1 }
 0x115   : > { %v598_v5 = vpack.c.bf16 %v584_v57, %v583_v41  ;;  %v795_v8 = vsel %vm3673_vm9, 0, %v794_v0  ;;  %v828_v9 = vsel %vm3680_vm10, 0, %v827_v2  ;;  %v791_v10 = vld [vmem:[#allocation2] sm:$0x1]  ;;  %v824_v11 = vld [vmem:[#allocation2 + $0x10] sm:$0x80]  ;;  %v703_v47 = vsel %vm3644_vm7, %v633_v60, %v702_v55 }
 0x116   : > { %707 = vst [vmem:[#allocation2 + $0x48] sm:$0xff] %v706_v3  ;;  %769 = vst [vmem:[#allocation2 + $0x58] sm:$0xff] %v768_v4  ;;  %v765_v12 = vsel %vm3651_vm8, %v731_v61, %v764_v56  ;;  %v792_v13 = vsel %vm3673_vm9, 0, %v791_v10  ;;  %v825_v14 = vsel %vm3680_vm10, 0, %v824_v11  ;;  %v597_v19 = vpack.c.bf16 %v582_v62, %v581_v50  ;;  %v3093_v24 = vpop.f32.mrb[12].mxu0  ;;  %v708_v45 = vld [vmem:[#allocation2 + $0x60] sm:$0xff] }
 0x117   : > { %796 = vst [vmem:[#allocation2 + $0x18] sm:$0x1] %v795_v8  ;;  %829 = vst [vmem:[#allocation2 + $0x28] sm:$0x80] %v828_v9  ;;  %v649_v15 = vshrl.u32 %v598_v5, 16  ;;  %v652_v16 = vshll.u32 %v598_v5, 16  ;;  %v675_v22 = vor.u32 %v673_v63, %v672_v6  ;;  %v551_v29 = vadd.f32 %v3093_v24, %v3627_v18 }
 0x118   : > { %704 = vst [vmem:[#allocation2 + $0x30] sm:$0xff] %v703_v47  ;;  %766 = vst [vmem:[#allocation2 + $0x40] sm:$0xff] %v765_v12  ;;  %v818_v17 = vld [vmem:[#allocation2 + $0xd8] sm:$0x1]  ;;  %v851_v21 = vld [vmem:[#allocation2 + $0xe8] sm:$0x80]  ;;  %v743_v36 = vor.u32 %v742_v23, %v670_v58 }
 0x119   : > { %608 = vst [vmem:[#allocation2 + $0x80] sm:$0xff] %v598_v5  ;;  %793 = vst [vmem:[#allocation2] sm:$0x1] %v792_v13  ;;  %v819_v20 = vsel %vm3673_vm9, 0, %v818_v17  ;;  %v651_v25 = vrot.slane %v649_v15, 7  ;;  %v736_v26 = vrot.slane %v652_v16, 1  ;;  %v721_v35 = vsel %vm3644_vm7, %v675_v22, %v720_v7 }
 0x11a   : > { %826 = vst [vmem:[#allocation2 + $0x10] sm:$0x80] %v825_v14  ;;  %820 = vst [vmem:[#allocation2 + $0xd8] sm:$0x1] %v819_v20  ;;  %v852_v27 = vsel %vm3680_vm10, 0, %v851_v21  ;;  %v542_v30 = vpop.f32.mrb[13].mxu0  ;;  %v783_v48 = vsel %vm3651_vm8, %v743_v36, %v782_v28 }
 0x11b   : > { %607 = vst [vmem:[#allocation2 + $0x68] sm:$0xff] %v597_v19  ;;  %v642_v33 = vshrl.u32 %v597_v19, 16  ;;  %v645_v34 = vshll.u32 %v597_v19, 16  ;;  %853 = vst [vmem:[#allocation2 + $0xe8] sm:$0x80] %v852_v27  ;;  %v3094_v37 = vpop.f32.mrb[14].mxu0  ;;  %v654_v38 = vor.u32 %v652_v16, %v651_v25  ;;  %v737_v39 = vor.u32 %v736_v26, %v649_v15 }
 0x11c   : > { %722 = vst [vmem:[#allocation2 + $0xc0] sm:$0xff] %v721_v35  ;;  %v587_v40 = vmax.f32 %v551_v29, 0.0  ;;  %v543_v41 = vadd.f32 %v3627_v18, %v542_v30  ;;  %v545_v42 = vpop.f32.mrb[15].mxu0  ;;  %v554_v49 = vadd.f32 %v3094_v37, %v3627_v18  ;;  %v770_v55 = vld [vmem:[#allocation2 + $0x70] sm:$0xff]  ;;  %784 = vst [vmem:[#allocation2 + $0xd0] sm:$0xff] %v783_v48  ;;  %v717_v22 = vld [vmem:[#allocation2 + $0xa8] sm:$0xff] }
 0x11d   : > { %v644_v43 = vrot.slane %v642_v33, 7  ;;  %v734_v46 = vrot.slane %v645_v34, 1  ;;  %v800_v50 = vld [vmem:[#allocation2 + $0x48] sm:$0x1]  ;;  %v833_v51 = vld [vmem:[#allocation2 + $0x58] sm:$0x80]  ;;  %v712_v53 = vsel %vm3644_vm7, %v654_v38, %v711_v31  ;;  %v774_v54 = vsel %vm3651_vm8, %v737_v39, %v773_v32 }
 0x11e   : > { %v585_v56 = vmax.f32 %v543_v41, 0.0  ;;  %v546_v57 = vadd.f32 %v3627_v18, %v545_v42  ;;  %v801_v58 = vsel %vm3673_vm9, 0, %v800_v50  ;;  %v834_v60 = vsel %vm3680_vm10, 0, %v833_v51  ;;  %713 = vst [vmem:[#allocation2 + $0x78] sm:$0xff] %v712_v53  ;;  %775 = vst [vmem:[#allocation2 + $0x88] sm:$0xff] %v774_v54  ;;  %v779_v26 = vld [vmem:[#allocation2 + $0xb8] sm:$0xff] }
 0x11f   : > { %v797_v61 = vld [vmem:[#allocation2 + $0x30] sm:$0x1]  ;;  %v830_v62 = vld [vmem:[#allocation2 + $0x40] sm:$0x80]  ;;  %v647_v63 = vor.u32 %v645_v34, %v644_v43  ;;  %v735_v0 = vor.u32 %v734_v46, %v642_v33  ;;  %802 = vst [vmem:[#allocation2 + $0x48] sm:$0x1] %v801_v58 }
 0x120   : > { %835 = vst [vmem:[#allocation2 + $0x58] sm:$0x80] %v834_v60  ;;  %v798_v2 = vsel %vm3673_vm9, 0, %v797_v61  ;;  %v831_v18 = vsel %vm3680_vm10, 0, %v830_v62  ;;  %v588_v3 = vmax.f32 %v554_v49, 0.0  ;;  %v586_v4 = vmax.f32 %v546_v57, 0.0 }
 0x121   : > { %799 = vst [vmem:[#allocation2 + $0x30] sm:$0x1] %v798_v2  ;;  %832 = vst [vmem:[#allocation2 + $0x40] sm:$0x80] %v831_v18  ;;  %v709_v5 = vsel %vm3644_vm7, %v647_v63, %v708_v45  ;;  %v771_v6 = vsel %vm3651_vm8, %v735_v0, %v770_v55  ;;  %v714_v27 = vld [vmem:[#allocation2 + $0x90] sm:$0xff]  ;;  %v776_v33 = vld [vmem:[#allocation2 + $0xa0] sm:$0xff] }
 0x122   : > { %710 = vst [vmem:[#allocation2 + $0x60] sm:$0xff] %v709_v5  ;;  %772 = vst [vmem:[#allocation2 + $0x70] sm:$0xff] %v771_v6  ;;  %v600_v7 = vpack.c.bf16 %v588_v3, %v587_v40  ;;  %v599_v8 = vpack.c.bf16 %v586_v4, %v585_v56  ;;  %v3504_v49 = vmov (!%p2546_p7), 0  }
 0x123   : > { %v815_v9 = vld [vmem:[#allocation2 + $0xc0] sm:$0x1]  ;;  %v848_v13 = vld [vmem:[#allocation2 + $0xd0] sm:$0x80]  ;;  %858 = vst [vmem:[#allocation2] sm:$0xff] (!%p2546_p7), %v3504_v49  ;;  %859 = vst [vmem:[#allocation2 + $0x8] sm:$0xff] (!%p2546_p7), %v3504_v49 }
 0x124   : > { %v816_v10 = vsel %vm3673_vm9, 0, %v815_v9  ;;  %610 = vst [vmem:[#allocation2 + $0xb0] sm:$0xff] %v600_v7  ;;  %v663_v11 = vshrl.u32 %v600_v7, 16  ;;  %v666_v47 = vshll.u32 %v600_v7, 16  ;;  %609 = vst [vmem:[#allocation2 + $0x98] sm:$0xff] %v599_v8  ;;  %v656_v12 = vshrl.u32 %v599_v8, 16 }
 0x125   : > { %817 = vst [vmem:[#allocation2 + $0xc0] sm:$0x1] %v816_v10  ;;  %v659_v14 = vshll.u32 %v599_v8, 16  ;;  %v806_v15 = vld [vmem:[#allocation2 + $0x78] sm:$0x1]  ;;  %v849_v17 = vsel %vm3680_vm10, 0, %v848_v13 }
 0x126   : > { %v839_v16 = vld [vmem:[#allocation2 + $0x88] sm:$0x80]  ;;  %v665_v19 = vrot.slane %v663_v11, 7  ;;  %v807_v20 = vsel %vm3673_vm9, 0, %v806_v15  ;;  %850 = vst [vmem:[#allocation2 + $0xd0] sm:$0x80] %v849_v17 }
 0x127   : > { %v840_v21 = vsel %vm3680_vm10, 0, %v839_v16  ;;  %v740_v23 = vrot.slane %v666_v47, 1  ;;  %v658_v24 = vrot.slane %v656_v12, 7  ;;  %808 = vst [vmem:[#allocation2 + $0x78] sm:$0x1] %v807_v20  ;;  %v738_v28 = vrot.slane %v659_v14, 1 }
 0x128   : > { %841 = vst [vmem:[#allocation2 + $0x88] sm:$0x80] %v840_v21  ;;  %v668_v25 = vor.u32 %v666_v47, %v665_v19  ;;  %860 = vst [vmem:[#allocation2 + $0x10] sm:$0xff] (!%p2546_p7), %v3504_v49 }
 0x129   : > { %v803_v29 = vld [vmem:[#allocation2 + $0x60] sm:$0x1]  ;;  %v836_v30 = vld [vmem:[#allocation2 + $0x70] sm:$0x80]  ;;  %v741_v31 = vor.u32 %v740_v23, %v663_v11  ;;  %v661_v32 = vor.u32 %v659_v14, %v658_v24  ;;  %v739_v37 = vor.u32 %v738_v28, %v656_v12 }
 0x12a   : > { %v804_v34 = vsel %vm3673_vm9, 0, %v803_v29  ;;  %v837_v35 = vsel %vm3680_vm10, 0, %v836_v30  ;;  %v718_v36 = vsel %vm3644_vm7, %v668_v25, %v717_v22 }
 0x12b   : > { %805 = vst [vmem:[#allocation2 + $0x60] sm:$0x1] %v804_v34  ;;  %838 = vst [vmem:[#allocation2 + $0x70] sm:$0x80] %v837_v35  ;;  %v780_v38 = vsel %vm3651_vm8, %v741_v31, %v779_v26  ;;  %v715_v39 = vsel %vm3644_vm7, %v661_v32, %v714_v27  ;;  %v777_v40 = vsel %vm3651_vm8, %v739_v37, %v776_v33 }
 0x12c   : > { %719 = vst [vmem:[#allocation2 + $0xa8] sm:$0xff] %v718_v36  ;;  %781 = vst [vmem:[#allocation2 + $0xb8] sm:$0xff] %v780_v38 }
 0x12d   : > { %716 = vst [vmem:[#allocation2 + $0x90] sm:$0xff] %v715_v39  ;;  %778 = vst [vmem:[#allocation2 + $0xa0] sm:$0xff] %v777_v40 }
 0x130   : > { %857 = sbr.rel (%p2546_p7) target bundleno = 311 (0x137), region = 52 }
 0x133   : > { %v812_v41 = vld [vmem:[#allocation2 + $0xa8] sm:$0x1]  ;;  %v845_v43 = vld [vmem:[#allocation2 + $0xb8] sm:$0x80] }
 0x134   : > { %v813_v42 = vsel %vm3673_vm9, 0, %v812_v41  ;;  %v809_v45 = vld [vmem:[#allocation2 + $0x90] sm:$0x1]  ;;  %v846_v46 = vsel %vm3680_vm10, 0, %v845_v43  ;;  %v842_v48 = vld [vmem:[#allocation2 + $0xa0] sm:$0x80] }
 0x135   : > { %814 = vst [vmem:[#allocation2 + $0xa8] sm:$0x1] %v813_v42  ;;  %v810_v59 = vsel %vm3673_vm9, 0, %v809_v45  ;;  %847 = vst [vmem:[#allocation2 + $0xb8] sm:$0x80] %v846_v46  ;;  %v843_v1 = vsel %vm3680_vm10, 0, %v842_v48 }
 0x136   : > { %811 = vst [vmem:[#allocation2 + $0x90] sm:$0x1] %v810_v59  ;;  %844 = vst [vmem:[#allocation2 + $0xa0] sm:$0x80] %v843_v1 }
 0x137 PF: > { %p2547_p8 = scmp.ne.s32.totalorder %s3486_s24, 1 }
 0x138   : > { %v3505_v44 = vmov (!%p2547_p8), 0  }
 0x139   : > { %864 = sbr.rel (%p2547_p8) target bundleno = 320 (0x140), region = 56  ;;  %866 = vst [vmem:[#allocation2 + $0xd8] sm:$0xff] (!%p2547_p8), %v3505_v44  ;;  %867 = vst [vmem:[#allocation2 + $0xe0] sm:$0xff] (!%p2547_p8), %v3505_v44 }
 0x13a   : > { %868 = vst [vmem:[#allocation2 + $0xe8] sm:$0xff] (!%p2547_p8), %v3505_v44 }
 0x140 PF: > { %v3384_v52 = vld [vmem:[%s4285_s3 + $0x100] sm:$0xff]   ;;  %v3387_v53 = vld [vmem:[%s4285_s3 + $0x108] sm:$0xff]   ;;  %v3390_v56 = vld [vmem:[%s4285_s3 + $0x110] sm:$0xff]  }
 0x141   : > { %v3385_v50 = vld [vmem:[%s4285_s3 + $0x140] sm:$0xff]   ;;  %2807 = vmatprep.subr.bf16.mxu1 %v3384_v52  ;;  %v3388_v54 = vld [vmem:[%s4285_s3 + $0x148] sm:$0xff]   ;;  %v3391_v57 = vld [vmem:[%s4285_s3 + $0x150] sm:$0xff]  }
 0x142   : > { %v3386_v51 = vld [vmem:[%s4285_s3 + $0xc0] sm:$0xff]   ;;  %3099 = vmatprep.subr.bf16.mxu0 %v3385_v50  ;;  %v3389_v55 = vld [vmem:[%s4285_s3 + $0xc8] sm:$0xff]   ;;  %v3392_v58 = vld [vmem:[%s4285_s3 + $0xd0] sm:$0xff]  }
 0x143   : > { %2808 = vmatpush3.bf16.msra.mxu1 %v3386_v51  ;;  %3100 = vmatpush3.bf16.msra.mxu0 %v3385_v50  ;;  %v3393_v60 = vld [vmem:[%s4285_s3 + $0x118] sm:$0xff]   ;;  %v3396_v63 = vld [vmem:[%s4285_s3 + $0x120] sm:$0xff]   ;;  %v3399_v18 = vld [vmem:[%s4285_s3 + $0x128] sm:$0xff]  }
 0x144   : > { %2809 = vmatprep.subr.bf16.mxu1 %v3387_v53  ;;  %3101 = vmatprep.subr.bf16.mxu0 %v3388_v54  ;;  %v3394_v61 = vld [vmem:[%s4285_s3 + $0x158] sm:$0xff]   ;;  %v3397_v0 = vld [vmem:[%s4285_s3 + $0x160] sm:$0xff]   ;;  %v3400_v3 = vld [vmem:[%s4285_s3 + $0x168] sm:$0xff]  }
 0x145   : > { %v3395_v62 = vld [vmem:[%s4285_s3 + $0xd8] sm:$0xff]   ;;  %v3398_v2 = vld [vmem:[%s4285_s3 + $0xe0] sm:$0xff]   ;;  %v3401_v4 = vld [vmem:[%s4285_s3 + $0xe8] sm:$0xff]  }
 0x146   : > { %v3402_v5 = vld [vmem:[%s4285_s3 + $0x130] sm:$0xff]   ;;  %v3405_v8 = vld [vmem:[%s4285_s3 + $0x138] sm:$0xff]   ;;  %v3826_v9 = vld [vmem:[#allocation2 + $0x20] sm:$0xff] }
 0x147   : > { %2810 = vmatpush3.bf16.msra.mxu1 %v3389_v55  ;;  %3102 = vmatpush3.bf16.msra.mxu0 %v3388_v54  ;;  %v3403_v6 = vld [vmem:[%s4285_s3 + $0x170] sm:$0xff]   ;;  %v3828_v10 = vld [vmem:[#allocation2 + $0x28] sm:$0xff]  ;;  %v3406_v11 = vld [vmem:[%s4285_s3 + $0x178] sm:$0xff]  }
 0x148   : > { %2811 = vmatprep.subr.bf16.mxu1 %v3390_v56  ;;  %3103 = vmatprep.subr.bf16.mxu0 %v3391_v57  ;;  %v3404_v7 = vld [vmem:[%s4285_s3 + $0xf0] sm:$0xff]   ;;  %v3407_v47 = vld [vmem:[%s4285_s3 + $0xf8] sm:$0xff]   ;;  %v3408_v12 = vld [vmem:[%s4285_s3 + $0x80] sm:$0xff]  }
 0x149   : > { %1191 = vmatprep.mubr.bf16.mxu1 %v3826_v9  ;;  %3115 = vmatprep.mubr.bf16.mxu0 %v3828_v10  ;;  %v3841_v13 = vld [vmem:[#allocation2 + $0x18] sm:$0xff]  ;;  %v3843_v14 = vld [vmem:[#allocation2 + $0x40] sm:$0xff]  ;;  %v3409_v15 = vld [vmem:[%s4285_s3 + $0x88] sm:$0xff]  }
 0x14a   : > { %v3848_v16 = vld [vmem:[#allocation2 + $0x38] sm:$0xff]  ;;  %v3410_v19 = vld [vmem:[%s4285_s3 + $0x90] sm:$0xff]   ;;  %v3415_v20 = vld [vmem:[%s4285_s3 + $0x40] sm:$0xff]  }
 0x14b   : > { %2812 = vmatpush3.bf16.msra.mxu1 %v3392_v58  ;;  %3104 = vmatpush3.bf16.msra.mxu0 %v3391_v57  ;;  %v3850_v17 = vld [vmem:[#allocation2 + $0x58] sm:$0xff]  ;;  %v3416_v21 = vld [vmem:[%s4285_s3] sm:$0xff]   ;;  %v3865_v22 = vld [vmem:[#allocation2 + $0x30] sm:$0xff] }
 0x14c   : > { %2813 = vmatprep.subr.bf16.mxu1 %v3393_v60  ;;  %3105 = vmatprep.subr.bf16.mxu0 %v3394_v61  ;;  %v3867_v23 = vld [vmem:[#allocation2 + $0x70] sm:$0xff]  ;;  %v3411_v24 = vld [vmem:[%s4285_s3 + $0x98] sm:$0xff]   ;;  %v3874_v26 = vld [vmem:[#allocation2 + $0x88] sm:$0xff] }
 0x14d   : > { %v3872_v25 = vld [vmem:[#allocation2 + $0x50] sm:$0xff]  ;;  %v3420_v27 = vld [vmem:[%s4285_s3 + $0x48] sm:$0xff]   ;;  %v3412_v29 = vld [vmem:[%s4285_s3 + $0xa0] sm:$0xff]  }
 0x14e   : > { %v3421_v28 = vld [vmem:[%s4285_s3 + $0x8] sm:$0xff]   ;;  %v3891_v31 = vld [vmem:[#allocation2 + $0xa0] sm:$0xff]  ;;  %v3424_v33 = vld [vmem:[%s4285_s3 + $0x50] sm:$0xff]  }
 0x14f   : > { %2814 = vmatpush3.bf16.msra.mxu1 %v3395_v62  ;;  %3106 = vmatpush3.bf16.msra.mxu0 %v3394_v61  ;;  %v3889_v30 = vld [vmem:[#allocation2 + $0x48] sm:$0xff]  ;;  %v3901_v35 = vld [vmem:[#allocation2 + $0xb8] sm:$0xff]  ;;  %v3426_v36 = vld [vmem:[%s4285_s3 + $0x10] sm:$0xff]  }
 0x150   : > { %2815 = vmatprep.subr.bf16.mxu1 %v3396_v63  ;;  %3107 = vmatprep.subr.bf16.mxu0 %v3397_v0  ;;  %v3413_v32 = vld [vmem:[%s4285_s3 + $0xa8] sm:$0xff]   ;;  %v3428_v37 = vld [vmem:[%s4285_s3 + $0x58] sm:$0xff]   ;;  %v3414_v38 = vld [vmem:[%s4285_s3 + $0xb0] sm:$0xff]  }
 0x151   : > { %v3899_v34 = vld [vmem:[#allocation2 + $0x68] sm:$0xff]  ;;  %v3916_v39 = vld [vmem:[#allocation2 + $0x60] sm:$0xff]  ;;  %v3430_v40 = vld [vmem:[%s4285_s3 + $0x18] sm:$0xff]  }
 0x152   : > { %v3921_v41 = vld [vmem:[#allocation2 + $0xd0] sm:$0xff]  ;;  %v3417_v42 = vld [vmem:[%s4285_s3 + $0xb8] sm:$0xff]   ;;  %v3926_v43 = vld [vmem:[#allocation2 + $0x80] sm:$0xff] }
 0x153   : > { %2816 = vmatpush3.bf16.msra.mxu1 %v3398_v2  ;;  %3108 = vmatpush3.bf16.msra.mxu0 %v3397_v0  ;;  %v871_v45 = vld [vmem:[#allocation2 + $0x10] sm:$0xff]  ;;  %v3432_v46 = vld [vmem:[%s4285_s3 + $0x60] sm:$0xff]   ;;  %v3436_v48 = vld [vmem:[%s4285_s3 + $0x68] sm:$0xff]  }
 0x154   : > { %2817 = vmatprep.subr.bf16.mxu1 %v3399_v18  ;;  %3109 = vmatprep.subr.bf16.mxu0 %v3400_v3  ;;  %v3434_v59 = vld [vmem:[%s4285_s3 + $0x20] sm:$0xff]   ;;  %v3943_v49 = vld [vmem:[#allocation2 + $0x78] sm:$0xff]  ;;  %v3422_v52 = vld [vmem:[%s4285_s3 + $0x1c8] sm:$0xff]  }
 0x155   : > { %v3418_v1 = vld [vmem:[%s4285_s3 + $0x1c0] sm:$0xff]   ;;  %v3951_v50 = vld [vmem:[#allocation2 + $0x98] sm:$0xff]  ;;  %v3438_v51 = vld [vmem:[%s4285_s3 + $0x28] sm:$0xff]  }
 0x156   : > { %v3419_v44 = vld [vmem:[%s4285_s3 + $0x180] sm:$0xff]   ;;  %v3440_v53 = vld [vmem:[%s4285_s3 + $0x70] sm:$0xff]   ;;  %v3423_v54 = vld [vmem:[%s4285_s3 + $0x188] sm:$0xff]  }
 0x157   : > { %2818 = vmatpush3.bf16.msra.mxu1 %v3401_v4  ;;  %3110 = vmatpush3.bf16.msra.mxu0 %v3400_v3  ;;  %v3425_v55 = vld [vmem:[%s4285_s3 + $0x1d0] sm:$0xff]   ;;  %v3429_v60 = vld [vmem:[%s4285_s3 + $0x1d8] sm:$0xff]   ;;  %v3433_v2 = vld [vmem:[%s4285_s3 + $0x1e0] sm:$0xff]  }
 0x158   : > { %2819 = vmatprep.subr.bf16.mxu1 %v3402_v5  ;;  %3111 = vmatprep.subr.bf16.mxu0 %v3403_v6  ;;  %v3442_v56 = vld [vmem:[%s4285_s3 + $0x30] sm:$0xff]   ;;  %v3444_v62 = vld [vmem:[%s4285_s3 + $0x78] sm:$0xff]   ;;  %v3998_v18 = vld [vmem:[#allocation2 + $0xa8] sm:$0xff] }
 0x159   : > { %v3972_v57 = vld [vmem:[#allocation2 + $0x90] sm:$0xff]  ;;  %v3446_v63 = vld [vmem:[%s4285_s3 + $0x38] sm:$0xff]   ;;  %v3435_v3 = vld [vmem:[%s4285_s3 + $0x1a0] sm:$0xff]  }
 0x15a   : > { %v3427_v58 = vld [vmem:[%s4285_s3 + $0x190] sm:$0xff]   ;;  %v3431_v0 = vld [vmem:[%s4285_s3 + $0x198] sm:$0xff]   ;;  %v3437_v4 = vld [vmem:[%s4285_s3 + $0x1e8] sm:$0xff]  }
 0x15b   : > { %2820 = vmatpush3.bf16.msra.mxu1 %v3404_v7  ;;  %3112 = vmatpush3.bf16.msra.mxu0 %v3403_v6  ;;  %v3980_v61 = vld [vmem:[#allocation2 + $0xb0] sm:$0xff]  ;;  %v4006_v5 = vld [vmem:[#allocation2 + $0xc8] sm:$0xff] }
 0x15c   : > { %2821 = vmatprep.subr.bf16.mxu1 %v3405_v8  ;;  %3113 = vmatprep.subr.bf16.mxu0 %v3406_v11  ;;  %v3439_v6 = vld [vmem:[%s4285_s3 + $0x1a8] sm:$0xff]   ;;  %v3441_v7 = vld [vmem:[%s4285_s3 + $0x1f0] sm:$0xff]   ;;  %v4018_v8 = vld [vmem:[#allocation2 + $0xc0] sm:$0xff] }
 0x15f   : > { %2822 = vmatpush3.bf16.msra.mxu1 %v3407_v47  ;;  %3114 = vmatpush3.bf16.msra.mxu0 %v3406_v11  ;;  %v3445_v11 = vld [vmem:[%s4285_s3 + $0x1f8] sm:$0xff]   ;;  %v870_v47 = vld [vmem:[#allocation2 + $0x8] sm:$0xff] }
 0x160   : > { %3131 = vmatprep.subr.bf16.mxu0 %v3408_v12  ;;  %2887 = vmatprep.subr.bf16.mxu1 %v3415_v20  ;;  %v3449_v20 = vld [vmem:[%s4285_s3 + $0x208] sm:$0xff]  }
 0x162   : > { %1192 = vmatmul.mubr.bf16.vlgmr.msra.gmra.mrb[4].mxu1 %v3841_v13  ;;  %3116 = vmatmul.mubr.bf16.vlgmr.msra.gmra.mrb[16].mxu0 %v3843_v14 }
 0x163   : > { %3132 = vmatpush3.bf16.msra.mxu0 %v3408_v12  ;;  %1199 = vmatprep.mubr.bf16.mxu1 %v3848_v16  ;;  %v3447_v12 = vld [vmem:[%s4285_s3 + $0x1b8] sm:$0xff]  }
 0x164   : > { %3133 = vmatprep.subr.bf16.mxu0 %v3409_v15  ;;  %3119 = vmatprep.mubr.bf16.mxu0 %v3850_v17 }
 0x165   : > { %2888 = vmatpush3.bf16.msra.mxu1 %v3416_v21  ;;  %v3450_v21 = vld [vmem:[%s4285_s3 + $0x210] sm:$0xff]  }
 0x166   : > { %2889 = vmatprep.subr.bf16.mxu1 %v3420_v27  ;;  %v3453_v27 = vld [vmem:[%s4285_s3 + $0x228] sm:$0xff]  }
 0x167   : > { %3134 = vmatpush3.bf16.msra.mxu0 %v3409_v15  ;;  %v3448_v15 = vld [vmem:[%s4285_s3 + $0x200] sm:$0xff]  }
 0x168   : > { %3135 = vmatprep.subr.bf16.mxu0 %v3410_v19 }
 0x169   : > { %2890 = vmatpush3.bf16.msra.mxu1 %v3421_v28  ;;  %v1715_v28 = vld [vmem:[#allocation2 + $0xe8] sm:$0xff] }
 0x16a   : > { %1200 = vmatmul.mubr.bf16.gmra.mrb[8].mxu1 %v3865_v22  ;;  %3120 = vmatmul.mubr.bf16.gmra.mrb[20].mxu0 %v3867_v23 }
 0x16b   : > { %3136 = vmatpush3.bf16.msra.mxu0 %v3410_v19  ;;  %1207 = vmatprep.mubr.bf16.mxu1 %v3872_v25  ;;  %v869_v19 = vld [vmem:[#allocation2] sm:$0xff] }
 0x16c   : > { %3137 = vmatprep.subr.bf16.mxu0 %v3411_v24  ;;  %3123 = vmatprep.mubr.bf16.mxu0 %v3874_v26 }
 0x16d   : > { %2891 = vmatprep.subr.bf16.mxu1 %v3424_v33 }
 0x16e   : > { %2892 = vmatpush3.bf16.msra.mxu1 %v3426_v36 }
 0x16f   : > { %3138 = vmatpush3.bf16.msra.mxu0 %v3411_v24  ;;  %2893 = vmatprep.subr.bf16.mxu1 %v3428_v37  ;;  %v3451_v24 = vld [vmem:[%s4285_s3 + $0x218] sm:$0xff]  }
 0x170   : > { %3139 = vmatprep.subr.bf16.mxu0 %v3412_v29 }
 0x172   : > { %1208 = vmatmul.mubr.bf16.gmra.mrb[12].mxu1 %v3889_v30  ;;  %3124 = vmatmul.mubr.bf16.gmra.mrb[24].mxu0 %v3891_v31 }
 0x173   : > { %3140 = vmatpush3.bf16.msra.mxu0 %v3412_v29  ;;  %1215 = vmatprep.mubr.bf16.mxu1 %v3899_v34  ;;  %v3456_v29 = vld [vmem:[%s4287_s5] sm:$0xff]  }
 0x174   : > { %3141 = vmatprep.subr.bf16.mxu0 %v3413_v32  ;;  %3127 = vmatprep.mubr.bf16.mxu0 %v3901_v35 }
 0x175   : > { %2894 = vmatpush3.bf16.msra.mxu1 %v3430_v40 }
 0x176   : > { %2895 = vmatprep.subr.bf16.mxu1 %v3432_v46 }
 0x177   : > { %3142 = vmatpush3.bf16.msra.mxu0 %v3413_v32 }
 0x178   : > { %3143 = vmatprep.subr.bf16.mxu0 %v3414_v38 }
 0x179   : > { %2896 = vmatpush3.bf16.msra.mxu1 %v3434_v59 }
 0x17a   : > { %1216 = vmatmul.mubr.bf16.gmra.mrb[16].mxu1 %v3916_v39  ;;  %3128 = vmatmul.mubr.bf16.gmra.mrb[28].mxu0 %v3921_v41 }
 0x17b   : > { %3144 = vmatpush3.bf16.msra.mxu0 %v3414_v38  ;;  %1223 = vmatprep.mubr.bf16.mxu1 %v3926_v43  ;;  %v3463_v38 = vld [vmem:[%s4287_s5 + $0x38] sm:$0xff]  }
 0x17c   : > { %3145 = vmatprep.subr.bf16.mxu0 %v3417_v42  ;;  %3147 = vmatprep.mubr.bf16.mxu0 %v871_v45 }
 0x17d   : > { %2897 = vmatprep.subr.bf16.mxu1 %v3436_v48 }
 0x17e   : > { %2898 = vmatpush3.bf16.msra.mxu1 %v3438_v51 }
 0x17f   : > { %3146 = vmatpush3.bf16.msra.mxu0 %v3417_v42  ;;  %2899 = vmatprep.subr.bf16.mxu1 %v3440_v53 }
 0x180   : > { %2967 = vmatprep.subr.bf16.mxu0 %v3418_v1 }
 0x182   : > { %1224 = vmatmul.mubr.bf16.gmra.mrb[20].mxu1 %v3943_v49  ;;  %3148 = vmatmul.mubr.bf16.vlgmr.msra.gmra.mrb[16].mxu0 %v3828_v10  ;;  %v3443_v10 = vld [vmem:[%s4285_s3 + $0x1b0] sm:$0xff]  }
 0x183   : > { %2968 = vmatpush3.bf16.msra.mxu0 %v3419_v44  ;;  %1231 = vmatprep.mubr.bf16.mxu1 %v3951_v50 }
 0x184   : > { %2969 = vmatprep.subr.bf16.mxu0 %v3422_v52  ;;  %3151 = vmatprep.mubr.bf16.mxu0 %v3843_v14 }
 0x185   : > { %2900 = vmatpush3.bf16.msra.mxu1 %v3442_v56 }
 0x186   : > { %2901 = vmatprep.subr.bf16.mxu1 %v3444_v62 }
 0x187   : > { %2970 = vmatpush3.bf16.msra.mxu0 %v3423_v54 }
 0x188   : > { %2971 = vmatprep.subr.bf16.mxu0 %v3425_v55 }
 0x189   : > { %2902 = vmatpush3.bf16.msra.mxu1 %v3446_v63 }
 0x18a   : > { %1232 = vmatmul.mubr.bf16.gmra.mrb[24].mxu1 %v3972_v57  ;;  %3152 = vmatmul.mubr.bf16.gmra.mrb[20].mxu0 %v3850_v17 }
 0x18b   : > { %2972 = vmatpush3.bf16.msra.mxu0 %v3427_v58  ;;  %1239 = vmatprep.mubr.bf16.mxu1 %v3980_v61 }
 0x18c   : > { %2973 = vmatprep.subr.bf16.mxu0 %v3429_v60  ;;  %3155 = vmatprep.mubr.bf16.mxu0 %v3867_v23 }
 0x18d   : > { %3195 = vmatprep.subr.bf16.mxu1 %v3456_v29 }
 0x18f   : > { %2974 = vmatpush3.bf16.msra.mxu0 %v3431_v0 }
 0x190   : > { %2975 = vmatprep.subr.bf16.mxu0 %v3433_v2 }
 0x192   : > { %1240 = vmatmul.mubr.bf16.gmra.mrb[28].mxu1 %v3998_v18  ;;  %3156 = vmatmul.mubr.bf16.gmra.mrb[24].mxu0 %v3874_v26 }
 0x193   : > { %2976 = vmatpush3.bf16.msra.mxu0 %v3435_v3  ;;  %1247 = vmatprep.mubr.bf16.mxu1 %v4006_v5 }
 0x194   : > { %2977 = vmatprep.subr.bf16.mxu0 %v3437_v4  ;;  %3159 = vmatprep.mubr.bf16.mxu0 %v3891_v31 }
 0x197   : > { %2978 = vmatpush3.bf16.msra.mxu0 %v3439_v6 }
 0x198   : > { %2979 = vmatprep.subr.bf16.mxu0 %v3441_v7 }
 0x19a   : > { %1248 = vmatmul.mubr.bf16.gmra.mrb[32].mxu1 %v4018_v8  ;;  %3160 = vmatmul.mubr.bf16.gmra.mrb[28].mxu0 %v3901_v35 }
 0x19b   : > { %2980 = vmatpush3.bf16.msra.mxu0 %v3443_v10  ;;  %1529 = vmatprep.mubr.bf16.mxu1 %v870_v47 }
 0x19c   : > { %2981 = vmatprep.subr.bf16.mxu0 %v3445_v11  ;;  %1941 = vmatprep.mubr.bf16.mxu0 %v3848_v16 }
 0x19f   : > { %2982 = vmatpush3.bf16.msra.mxu0 %v3447_v12 }
 0x1a0   : > { %3163 = vmatprep.subr.bf16.mxu0 %v3448_v15 }
 0x1a2   : > { %1530 = vmatmul.mubr.bf16.vlgmr.msra.gmra.mrb[36].mxu1 %v869_v19  ;;  %1942 = vmatmul.mubr.bf16.vlgmr.msra.gmra.mrb[32].mxu0 %v3865_v22 }
 0x1a3   : > { %3164 = vmatpush3.bf16.msra.mxu0 %v3448_v15  ;;  %1537 = vmatprep.mubr.bf16.mxu1 %v3826_v9  ;;  %v3452_v9 = vld [vmem:[%s4285_s3 + $0x220] sm:$0xff]  }
 0x1a4   : > { %1949 = vmatprep.mubr.bf16.mxu0 %v3872_v25  ;;  %3165 = vmatprep.subr.bf16.mxu0 %v3449_v20 }
 0x1a5   : > { %3196 = vmatpush3.bf16.msra.mxu1 %v3456_v29 }
 0x1a7   : > { %3166 = vmatpush3.bf16.msra.mxu0 %v3449_v20 }
 0x1a8   : > { %3167 = vmatprep.subr.bf16.mxu0 %v3450_v21 }
 0x1aa   : > { %1538 = vmatmul.mubr.bf16.gmra.mrb[40].mxu1 %v3841_v13  ;;  %1950 = vmatmul.mubr.bf16.gmra.mrb[36].mxu0 %v3889_v30  ;;  %v3454_v13 = vld [vmem:[%s4285_s3 + $0x230] sm:$0xff]  }
 0x1ab   : > { %1545 = vmatprep.mubr.bf16.mxu1 %v3848_v16  ;;  %1957 = vmatprep.mubr.bf16.mxu0 %v3899_v34  ;;  %v3455_v16 = vld [vmem:[%s4285_s3 + $0x238] sm:$0xff]  }
 0x1ac   : > { %3168 = vmatpush3.bf16.msra.mxu0 %v3450_v21 }
 0x1ad   : > { %3169 = vmatprep.subr.bf16.mxu0 %v3451_v24 }
 0x1b0   : > { %3170 = vmatpush3.bf16.msra.mxu0 %v3451_v24 }
 0x1b1   : > { %3171 = vmatprep.subr.bf16.mxu0 %v3452_v9 }
 0x1b2   : > { %1546 = vmatmul.mubr.bf16.gmra.mrb[44].mxu1 %v3865_v22  ;;  %1958 = vmatmul.mubr.bf16.gmra.mrb[40].mxu0 %v3916_v39  ;;  %v1714_v22 = vld [vmem:[#allocation2 + $0xe0] sm:$0xff] }
 0x1b3   : > { %1553 = vmatprep.mubr.bf16.mxu1 %v3872_v25  ;;  %1965 = vmatprep.mubr.bf16.mxu0 %v3926_v43  ;;  %v1713_v25 = vld [vmem:[#allocation2 + $0xd8] sm:$0xff] }
 0x1b4   : > { %3172 = vmatpush3.bf16.msra.mxu0 %v3452_v9 }
 0x1b5   : > { %3173 = vmatprep.subr.bf16.mxu0 %v3453_v27 }
 0x1b8   : > { %3174 = vmatpush3.bf16.msra.mxu0 %v3453_v27 }
 0x1b9   : > { %3175 = vmatprep.subr.bf16.mxu0 %v3454_v13 }
 0x1ba   : > { %1554 = vmatmul.mubr.bf16.gmra.mrb[48].mxu1 %v3889_v30  ;;  %1966 = vmatmul.mubr.bf16.gmra.mrb[44].mxu0 %v3943_v49  ;;  %v3461_v30 = vld [vmem:[%s4287_s5 + $0x28] sm:$0xff]  }
 0x1bb   : > { %1561 = vmatprep.mubr.bf16.mxu1 %v3899_v34  ;;  %1973 = vmatprep.mubr.bf16.mxu0 %v3951_v50 }
 0x1bc   : > { %3176 = vmatpush3.bf16.msra.mxu0 %v3454_v13 }
 0x1bd   : > { %3177 = vmatprep.subr.bf16.mxu0 %v3455_v16 }
 0x1c0   : > { %3178 = vmatpush3.bf16.msra.mxu0 %v3455_v16 }
 0x1c2   : > { %1562 = vmatmul.mubr.bf16.gmra.mrb[52].mxu1 %v3916_v39  ;;  %1974 = vmatmul.mubr.bf16.gmra.mrb[48].mxu0 %v3972_v57 }
 0x1c3   : > { %1569 = vmatprep.mubr.bf16.mxu1 %v3926_v43  ;;  %1981 = vmatprep.mubr.bf16.mxu0 %v3980_v61 }
 0x1ca   : > { %1570 = vmatmul.mubr.bf16.gmra.mrb[56].mxu1 %v3943_v49  ;;  %1982 = vmatmul.mubr.bf16.gmra.mrb[52].mxu0 %v3998_v18 }
 0x1cb   : > { %1577 = vmatprep.mubr.bf16.mxu1 %v3951_v50  ;;  %1989 = vmatprep.mubr.bf16.mxu0 %v4006_v5 }
 0x1d2   : > { %1578 = vmatmul.mubr.bf16.gmra.mrb[60].mxu1 %v3972_v57  ;;  %1990 = vmatmul.mubr.bf16.gmra.mrb[56].mxu0 %v4018_v8 }
 0x1d3   : > { %1585 = vmatprep.mubr.bf16.mxu1 %v3980_v61  ;;  %1997 = vmatprep.mubr.bf16.mxu0 %v1714_v22 }
 0x1da   : > { %1586 = vmatmul.mubr.bf16.gmra.mrb[64].mxu1 %v3998_v18  ;;  %1998 = vmatmul.mubr.bf16.gmra.mrb[60].mxu0 %v1713_v25 }
 0x1db   : > { %3179 = vmatprep.mubr.bf16.mxu0 %v3843_v14  ;;  %v3457_v14 = vld [vmem:[%s4287_s5 + $0x8] sm:$0xff]  }
 0x1dc   : > { %3197 = vmatprep.subr.bf16.mxu1 %v3457_v14 }
 0x1dd   : > { %3198 = vmatpush3.bf16.msra.mxu1 %v3457_v14 }
 0x1e2   : > { %3180 = vmatmul.mubr.bf16.vlgmr.msra.gmra.mrb[16].mxu0 %v3850_v17  ;;  %v3458_v17 = vld [vmem:[%s4287_s5 + $0x10] sm:$0xff]  }
 0x1e3   : > { %3183 = vmatprep.mubr.bf16.mxu0 %v3867_v23  ;;  %3199 = vmatprep.subr.bf16.mxu1 %v3458_v17  ;;  %v3459_v23 = vld [vmem:[%s4287_s5 + $0x18] sm:$0xff]  }
 0x1e4   : > { %3200 = vmatpush3.bf16.msra.mxu1 %v3458_v17 }
 0x1e5   : > { %3201 = vmatprep.subr.bf16.mxu1 %v3459_v23 }
 0x1e8   : > { %3202 = vmatpush3.bf16.msra.mxu1 %v3459_v23 }
 0x1ea   : > { %3184 = vmatmul.mubr.bf16.gmra.mrb[20].mxu0 %v3874_v26  ;;  %v3460_v26 = vld [vmem:[%s4287_s5 + $0x20] sm:$0xff]  }
 0x1eb   : > { %3187 = vmatprep.mubr.bf16.mxu0 %v3891_v31  ;;  %3203 = vmatprep.subr.bf16.mxu1 %v3460_v26  ;;  %v3462_v31 = vld [vmem:[%s4287_s5 + $0x30] sm:$0xff]  }
 0x1ec   : > { %3204 = vmatpush3.bf16.msra.mxu1 %v3460_v26 }
 0x1ed   : > { %3205 = vmatprep.subr.bf16.mxu1 %v3461_v30 }
 0x1f0   : > { %3206 = vmatpush3.bf16.msra.mxu1 %v3461_v30 }
 0x1f1   : > { %3207 = vmatprep.subr.bf16.mxu1 %v3462_v31 }
 0x1f2   : > { %3188 = vmatmul.mubr.bf16.gmra.mrb[24].mxu0 %v3901_v35 }
 0x1f3   : > { %3191 = vmatprep.mubr.bf16.mxu0 %v3921_v41 }
 0x1f4   : > { %3208 = vmatpush3.bf16.msra.mxu1 %v3462_v31 }
 0x1f5   : > { %3209 = vmatprep.subr.bf16.mxu1 %v3463_v38 }
 0x1f8   : > { %3210 = vmatpush3.bf16.msra.mxu1 %v3463_v38 }
 0x1fa   : > { %3192 = vmatmul.mubr.bf16.gmra.mrb[28].mxu0 %v1715_v28 }
 0x235   : > { %v2823_v32 = vpop.f32.mrb[4].mxu1 }
 0x236   : > { %v2824_v33 = vpop.f32.mrb[5].mxu1 }
 0x237   : > { %v2825_v34 = vadd.f32 %v2824_v33, %v2823_v32  ;;  %v2826_v35 = vpop.f32.mrb[6].mxu1 }
 0x238   : > { %v2827_v36 = vpop.f32.mrb[7].mxu1 }
 0x239   : > { %v2828_v37 = vadd.f32 %v2827_v36, %v2826_v35 }
 0x23d   : > { %v2829_v39 = vpop.f32.mrb[8].mxu1 }
 0x23e   : > { %v2830_v40 = vpop.f32.mrb[9].mxu1 }
 0x23f   : > { %v4114_v41 = vadd.f32 %v2830_v40, %v2829_v39  ;;  %v2832_v42 = vpop.f32.mrb[10].mxu1 }
 0x240   : > { %v2833_v43 = vpop.f32.mrb[11].mxu1 }
 0x241   : > { %v4116_v45 = vadd.f32 %v2833_v43, %v2832_v42 }
 0x245   : > { %v2835_v46 = vpop.f32.mrb[12].mxu1 }
 0x246   : > { %v2836_v59 = vpop.f32.mrb[13].mxu1 }
 0x247   : > { %v4118_v48 = vadd.f32 %v2836_v59, %v2835_v46  ;;  %v2838_v1 = vpop.f32.mrb[14].mxu1 }
 0x248   : > { %v2839_v49 = vpop.f32.mrb[15].mxu1 }
 0x249   : > { %v4120_v44 = vadd.f32 %v2839_v49, %v2838_v1 }
 0x24d   : > { %v2841_v52 = vpop.f32.mrb[16].mxu1 }
 0x24e   : > { %v2842_v50 = vpop.f32.mrb[17].mxu1 }
 0x24f   : > { %v4122_v51 = vadd.f32 %v2842_v50, %v2841_v52  ;;  %v2844_v53 = vpop.f32.mrb[18].mxu1 }
 0x250   : > { %v2845_v54 = vpop.f32.mrb[19].mxu1 }
 0x251   : > { %v4124_v55 = vadd.f32 %v2845_v54, %v2844_v53 }
 0x255   : > { %v2847_v56 = vpop.f32.mrb[20].mxu1 }
 0x256   : > { %v2848_v57 = vpop.f32.mrb[21].mxu1 }
 0x257   : > { %v4126_v58 = vadd.f32 %v2848_v57, %v2847_v56  ;;  %v2850_v60 = vpop.f32.mrb[22].mxu1 }
 0x258   : > { %v2851_v61 = vpop.f32.mrb[23].mxu1 }
 0x259   : > { %v4128_v62 = vadd.f32 %v2851_v61, %v2850_v60 }
 0x25d   : > { %v2853_v63 = vpop.f32.mrb[24].mxu1 }
 0x25e   : > { %v2854_v0 = vpop.f32.mrb[25].mxu1 }
 0x25f   : > { %v4130_v2 = vadd.f32 %v2854_v0, %v2853_v63  ;;  %v2856_v18 = vpop.f32.mrb[26].mxu1 }
 0x260   : > { %v2857_v3 = vpop.f32.mrb[27].mxu1 }
 0x261   : > { %v4132_v4 = vadd.f32 %v2857_v3, %v2856_v18 }
 0x265   : > { %v2859_v5 = vpop.f32.mrb[28].mxu1 }
 0x266   : > { %v2860_v6 = vpop.f32.mrb[29].mxu1 }
 0x267   : > { %v4134_v7 = vadd.f32 %v2860_v6, %v2859_v5  ;;  %v2862_v8 = vpop.f32.mrb[30].mxu1 }
 0x268   : > { %v2863_v10 = vpop.f32.mrb[31].mxu1 }
 0x269   : > { %v4136_v11 = vadd.f32 %v2863_v10, %v2862_v8 }
 0x26d   : > { %v2865_v47 = vpop.f32.mrb[32].mxu1 }
 0x26e   : > { %v2866_v12 = vpop.f32.mrb[33].mxu1 }
 0x26f   : > { %v4138_v15 = vadd.f32 %v2866_v12, %v2865_v47  ;;  %v2868_v19 = vpop.f32.mrb[34].mxu1 }
 0x270   : > { %v2869_v20 = vpop.f32.mrb[35].mxu1 }
 0x271   : > { %v4140_v21 = vadd.f32 %v2869_v20, %v2868_v19 }
 0x275   : > { %v2903_v24 = vpop.f32.mrb[36].mxu1  ;;  %v2983_v9 = vpop.f32.mrb[32].mxu0 }
 0x276   : > { %v2904_v27 = vpop.f32.mrb[37].mxu1  ;;  %v2984_v13 = vpop.f32.mrb[33].mxu0 }
 0x277   : > { %v2905_v16 = vadd.f32 %v2904_v27, %v2903_v24  ;;  %v2985_v22 = vadd.f32 %v2984_v13, %v2983_v9  ;;  %v2906_v25 = vpop.f32.mrb[38].mxu1  ;;  %v2986_v28 = vpop.f32.mrb[34].mxu0 }
 0x278   : > { %v2907_v29 = vpop.f32.mrb[39].mxu1  ;;  %v2987_v14 = vpop.f32.mrb[35].mxu0 }
 0x279   : > { %v3246_v17 = vadd.f32 %v2905_v16, %v2825_v34  ;;  %v2908_v23 = vadd.f32 %v2907_v29, %v2906_v25  ;;  %v2988_v26 = vadd.f32 %v2987_v14, %v2986_v28 }
 0x27b   : > { %v3252_v30 = vadd.f32 %v2908_v23, %v2828_v37  ;;  %v4142_v31 = vadd.f32 %v3246_v17, %v2985_v22 }
 0x27d   : > { %v2909_v32 = vpop.f32.mrb[40].mxu1  ;;  %v2989_v33 = vpop.f32.mrb[36].mxu0  ;;  %v4144_v35 = vadd.f32 %v3252_v30, %v2988_v26 }
 0x27e   : > { %v2910_v36 = vpop.f32.mrb[41].mxu1  ;;  %v2990_v38 = vpop.f32.mrb[37].mxu0 }
 0x27f   : > { %v2911_v39 = vadd.f32 %v2910_v36, %v2909_v32  ;;  %v2991_v40 = vadd.f32 %v2990_v38, %v2989_v33  ;;  %v2912_v42 = vpop.f32.mrb[42].mxu1  ;;  %v2992_v43 = vpop.f32.mrb[38].mxu0 }
 0x280   : > { %v2913_v46 = vpop.f32.mrb[43].mxu1  ;;  %v2993_v59 = vpop.f32.mrb[39].mxu0 }
 0x281   : > { %v3243_v1 = vadd.f32 %v2911_v39, %v4114_v41  ;;  %v2914_v34 = vadd.f32 %v2913_v46, %v2912_v42  ;;  %v2994_v49 = vadd.f32 %v2993_v59, %v2992_v43 }
 0x283   : > { %v3249_v37 = vadd.f32 %v2914_v34, %v4116_v45  ;;  %v4148_v52 = vadd.f32 %v3243_v1, %v2991_v40 }
 0x285   : > { %v2915_v50 = vpop.f32.mrb[44].mxu1  ;;  %v2995_v53 = vpop.f32.mrb[40].mxu0  ;;  %v4150_v54 = vadd.f32 %v3249_v37, %v2994_v49 }
 0x286   : > { %v2916_v56 = vpop.f32.mrb[45].mxu1  ;;  %v2996_v57 = vpop.f32.mrb[41].mxu0 }
 0x287   : > { %v2917_v60 = vadd.f32 %v2916_v56, %v2915_v50  ;;  %v2997_v61 = vadd.f32 %v2996_v57, %v2995_v53  ;;  %v2918_v63 = vpop.f32.mrb[46].mxu1  ;;  %v2998_v0 = vpop.f32.mrb[42].mxu0 }
 0x288   : > { %v2919_v18 = vpop.f32.mrb[47].mxu1  ;;  %v2999_v3 = vpop.f32.mrb[43].mxu0 }
 0x289   : > { %v3258_v41 = vadd.f32 %v2917_v60, %v4118_v48  ;;  %v2920_v5 = vadd.f32 %v2919_v18, %v2918_v63  ;;  %v3000_v6 = vadd.f32 %v2999_v3, %v2998_v0 }
 0x28b   : > { %v3264_v45 = vadd.f32 %v2920_v5, %v4120_v44  ;;  %v4154_v8 = vadd.f32 %v3258_v41, %v2997_v61 }
 0x28d   : > { %v2921_v10 = vpop.f32.mrb[48].mxu1  ;;  %v3001_v47 = vpop.f32.mrb[44].mxu0  ;;  %v4156_v12 = vadd.f32 %v3264_v45, %v3000_v6 }
 0x28e   : > { %v2922_v19 = vpop.f32.mrb[49].mxu1  ;;  %v3002_v20 = vpop.f32.mrb[45].mxu0 }
 0x28f   : > { %v2923_v24 = vadd.f32 %v2922_v19, %v2921_v10  ;;  %v3003_v9 = vadd.f32 %v3002_v20, %v3001_v47  ;;  %v2924_v27 = vpop.f32.mrb[50].mxu1  ;;  %v3004_v13 = vpop.f32.mrb[46].mxu0 }
 0x290   : > { %v2925_v16 = vpop.f32.mrb[51].mxu1  ;;  %v3005_v22 = vpop.f32.mrb[47].mxu0 }
 0x291   : > { %v3255_v48 = vadd.f32 %v2923_v24, %v4122_v51  ;;  %v2926_v25 = vadd.f32 %v2925_v16, %v2924_v27  ;;  %v3006_v28 = vadd.f32 %v3005_v22, %v3004_v13 }
 0x293   : > { %v3261_v44 = vadd.f32 %v2926_v25, %v4124_v55  ;;  %v4160_v29 = vadd.f32 %v3255_v48, %v3003_v9 }
 0x295   : > { %v2927_v14 = vpop.f32.mrb[52].mxu1  ;;  %v3007_v17 = vpop.f32.mrb[48].mxu0  ;;  %v4162_v23 = vadd.f32 %v3261_v44, %v3006_v28 }
 0x296   : > { %v2928_v26 = vpop.f32.mrb[53].mxu1  ;;  %v3008_v30 = vpop.f32.mrb[49].mxu0 }
 0x297   : > { %v2929_v32 = vadd.f32 %v2928_v26, %v2927_v14  ;;  %v3009_v33 = vadd.f32 %v3008_v30, %v3007_v17  ;;  %v2930_v36 = vpop.f32.mrb[54].mxu1  ;;  %v3010_v38 = vpop.f32.mrb[50].mxu0 }
 0x298   : > { %v2931_v39 = vpop.f32.mrb[55].mxu1  ;;  %v3011_v40 = vpop.f32.mrb[51].mxu0 }
 0x299   : > { %v3270_v51 = vadd.f32 %v2929_v32, %v4126_v58  ;;  %v2932_v42 = vadd.f32 %v2931_v39, %v2930_v36  ;;  %v3012_v43 = vadd.f32 %v3011_v40, %v3010_v38 }
 0x29b   : > { %v3276_v55 = vadd.f32 %v2932_v42, %v4128_v62  ;;  %v4166_v46 = vadd.f32 %v3270_v51, %v3009_v33  ;;  %v4187_v51 = vld [vmem:[%s4286_s4] ss:$0 sm:$0xff] }
 0x29d   : > { %v2933_v59 = vpop.f32.mrb[56].mxu1  ;;  %v3013_v1 = vpop.f32.mrb[52].mxu0  ;;  %v4168_v34 = vadd.f32 %v3276_v55, %v3012_v43 }
 0x29e   : > { %v2934_v49 = vpop.f32.mrb[57].mxu1  ;;  %v3014_v37 = vpop.f32.mrb[53].mxu0 }
 0x29f   : > { %v2935_v50 = vadd.f32 %v2934_v49, %v2933_v59  ;;  %v3015_v53 = vadd.f32 %v3014_v37, %v3013_v1  ;;  %v2936_v56 = vpop.f32.mrb[58].mxu1  ;;  %v3016_v57 = vpop.f32.mrb[54].mxu0 }
 0x2a0   : > { %v2937_v60 = vpop.f32.mrb[59].mxu1  ;;  %v3017_v61 = vpop.f32.mrb[55].mxu0 }
 0x2a1   : > { %v3267_v58 = vadd.f32 %v2935_v50, %v4130_v2  ;;  %v2938_v63 = vadd.f32 %v2937_v60, %v2936_v56  ;;  %v3018_v0 = vadd.f32 %v3017_v61, %v3016_v57 }
 0x2a3   : > { %v3273_v62 = vadd.f32 %v2938_v63, %v4132_v4  ;;  %v4172_v18 = vadd.f32 %v3267_v58, %v3015_v53 }
 0x2a5   : > { %v2939_v3 = vpop.f32.mrb[60].mxu1  ;;  %v3019_v41 = vpop.f32.mrb[56].mxu0  ;;  %v4174_v5 = vadd.f32 %v3273_v62, %v3018_v0 }
 0x2a6   : > { %v2940_v6 = vpop.f32.mrb[61].mxu1  ;;  %v3020_v45 = vpop.f32.mrb[57].mxu0 }
 0x2a7   : > { %v2941_v10 = vadd.f32 %v2940_v6, %v2939_v3  ;;  %v3021_v47 = vadd.f32 %v3020_v45, %v3019_v41  ;;  %v2942_v19 = vpop.f32.mrb[62].mxu1  ;;  %v3022_v20 = vpop.f32.mrb[58].mxu0 }
 0x2a8   : > { %v2943_v24 = vpop.f32.mrb[63].mxu1  ;;  %v3023_v9 = vpop.f32.mrb[59].mxu0 }
 0x2a9   : > { %v3282_v2 = vadd.f32 %v2941_v10, %v4134_v7  ;;  %v2944_v27 = vadd.f32 %v2943_v24, %v2942_v19  ;;  %v3024_v13 = vadd.f32 %v3023_v9, %v3022_v20 }
 0x2ab   : > { %v3288_v4 = vadd.f32 %v2944_v27, %v4136_v11  ;;  %v4178_v16 = vadd.f32 %v3282_v2, %v3021_v47 }
 0x2ad   : > { %v2945_v22 = vpop.f32.mrb[64].mxu1  ;;  %v3025_v48 = vpop.f32.mrb[60].mxu0  ;;  %v4180_v25 = vadd.f32 %v3288_v4, %v3024_v13 }
 0x2ae   : > { %v2946_v28 = vpop.f32.mrb[65].mxu1  ;;  %v3026_v44 = vpop.f32.mrb[61].mxu0 }
 0x2af   : > { %v2947_v14 = vadd.f32 %v2946_v28, %v2945_v22  ;;  %v3027_v17 = vadd.f32 %v3026_v44, %v3025_v48  ;;  %v2948_v26 = vpop.f32.mrb[66].mxu1  ;;  %v3028_v30 = vpop.f32.mrb[62].mxu0 }
 0x2b0   : > { %v2949_v32 = vpop.f32.mrb[67].mxu1  ;;  %v3029_v33 = vpop.f32.mrb[63].mxu0 }
 0x2b1   : > { %v3279_v7 = vadd.f32 %v2947_v14, %v4138_v15  ;;  %v2950_v36 = vadd.f32 %v2949_v32, %v2948_v26  ;;  %v3030_v38 = vadd.f32 %v3029_v33, %v3028_v30 }
 0x2b3   : > { %v3285_v11 = vadd.f32 %v2950_v36, %v4140_v21  ;;  %v3280_v39 = vadd.f32 %v3279_v7, %v3027_v17 }
 0x2b5   : > { %v3181_v40 = vpop.f32.mrb[16].mxu0  ;;  %v4189_v42 = vadd.f32 %v3285_v11, %v3030_v38 }
 0x2b6   : > { %v3245_v43 = vadd.f32 %v4148_v52, %v3181_v40  ;;  %v2040_v55 = vpop.f32.mrb[17].mxu0 }
 0x2b7   : > { %v3248_v59 = vadd.f32 %v4142_v31, %v2040_v55  ;;  %v3182_v1 = vpop.f32.mrb[18].mxu0 }
 0x2b8   : > { %v2128_v15 = vadd.f32 %v3245_v43, %v4187_v51  ;;  %v3251_v49 = vadd.f32 %v4150_v54, %v3182_v1  ;;  %v2043_v21 = vpop.f32.mrb[19].mxu0 }
 0x2b9   : > { %v2126_v37 = vadd.f32 %v3248_v59, %v4187_v51  ;;  %v3254_v50 = vadd.f32 %v4144_v35, %v2043_v21 }
 0x2ba   : > { %v2129_v53 = vadd.f32 %v3251_v49, %v4187_v51  ;;  %v2144_v57 = vmax.f32 %v2128_v15, 0.0 }
 0x2bb   : > { %v2127_v56 = vadd.f32 %v3254_v50, %v4187_v51  ;;  %v2142_v52 = vmax.f32 %v2126_v37, 0.0 }
 0x2bc   : > { %v2145_v60 = vmax.f32 %v2129_v53, 0.0 }
 0x2bd   : > { %v2143_v61 = vmax.f32 %v2127_v56, 0.0  ;;  %v3185_v58 = vpop.f32.mrb[20].mxu0  ;;  %v2781_v56 = vld [vmem:[%s3595_s10 + $0x8] sm:$0xff]  }
 0x2be   : > { %v2159_v31 = vpack.c.bf16 %v2145_v60, %v2144_v57  ;;  %v3257_v63 = vadd.f32 %v4160_v29, %v3185_v58  ;;  %v2056_v0 = vpop.f32.mrb[21].mxu0 }
 0x2bf   : > { %v3260_v54 = vadd.f32 %v4154_v8, %v2056_v0  ;;  %v3186_v62 = vpop.f32.mrb[22].mxu0  ;;  %v2158_v3 = vpack.c.bf16 %v2143_v61, %v2142_v52  ;;  %v2752_v0 = vunpack.c.h.bf16 %v2781_v56 }
 0x2c0   : > { %v2132_v41 = vadd.f32 %v3257_v63, %v4187_v51  ;;  %v3263_v35 = vadd.f32 %v4162_v23, %v3186_v62  ;;  %v2059_v6 = vpop.f32.mrb[23].mxu0 }
 0x2c1   : > { %v2130_v45 = vadd.f32 %v3260_v54, %v4187_v51  ;;  %v3266_v10 = vadd.f32 %v4156_v12, %v2059_v6  ;;  %3211 = vmatprep.mubr.bf16.mxu1 %v2158_v3  ;;  %v2784_v6 = vld [vmem:[%s3595_s10 + $0x20] sm:$0xff]  }
 0x2c2   : > { %v2133_v47 = vadd.f32 %v3263_v35, %v4187_v51  ;;  %3212 = vmatmul.mubr.bf16.vlgmr.msra.gmra.mrb[68].mxu1 %v2159_v31  ;;  %v2148_v19 = vmax.f32 %v2132_v41, 0.0 }
 0x2c3   : > { %v2131_v29 = vadd.f32 %v3266_v10, %v4187_v51  ;;  %v2146_v8 = vmax.f32 %v2130_v45, 0.0 }
 0x2c4   : > { %v2149_v20 = vmax.f32 %v2133_v47, 0.0  ;;  %v2783_v47 = vld [vmem:[%s3595_s10 + $0x18] sm:$0xff]  }
 0x2c5   : > { %v2147_v24 = vmax.f32 %v2131_v29, 0.0  ;;  %v3189_v9 = vpop.f32.mrb[24].mxu0 }
 0x2c6   : > { %v3269_v2 = vadd.f32 %v4172_v18, %v3189_v9  ;;  %v2072_v27 = vpop.f32.mrb[25].mxu0  ;;  %v2161_v23 = vpack.c.bf16 %v2149_v20, %v2148_v19 }
 0x2c7   : > { %v3272_v13 = vadd.f32 %v4166_v46, %v2072_v27  ;;  %v3190_v4 = vpop.f32.mrb[26].mxu0  ;;  %v2160_v22 = vpack.c.bf16 %v2147_v24, %v2146_v8  ;;  %v2763_v8 = vunpack.c.l.bf16 %v2784_v6 }
 0x2c8   : > { %v2136_v12 = vadd.f32 %v3269_v2, %v4187_v51  ;;  %v3275_v48 = vadd.f32 %v4174_v5, %v3190_v4  ;;  %v2075_v28 = vpop.f32.mrb[27].mxu0  ;;  %v2759_v2 = vunpack.c.l.bf16 %v2783_v47 }
 0x2c9   : > { %v2134_v44 = vadd.f32 %v3272_v13, %v4187_v51  ;;  %v3278_v14 = vadd.f32 %v4168_v34, %v2075_v28  ;;  %3215 = vmatprep.mubr.bf16.mxu1 %v2160_v22  ;;  %v2764_v13 = vunpack.c.h.bf16 %v2784_v6 }
 0x2ca   : > { %v2137_v17 = vadd.f32 %v3275_v48, %v4187_v51  ;;  %3216 = vmatmul.mubr.bf16.gmra.mrb[72].mxu1 %v2161_v23  ;;  %v2152_v26 = vmax.f32 %v2136_v12, 0.0  ;;  %v2760_v12 = vunpack.c.h.bf16 %v2783_v47 }
 0x2cb   : > { %v2135_v18 = vadd.f32 %v3278_v14, %v4187_v51  ;;  %v2150_v46 = vmax.f32 %v2134_v44, 0.0 }
 0x2cc   : > { %v2153_v30 = vmax.f32 %v2137_v17, 0.0 }
 0x2cd   : > { %v2151_v32 = vmax.f32 %v2135_v18, 0.0  ;;  %v3193_v33 = vpop.f32.mrb[28].mxu0  ;;  %v2786_v18 = vld [vmem:[%s3595_s10 + $0x30] sm:$0xff]  }
 0x2ce   : > { %v3281_v7 = vadd.f32 %v3280_v39, %v3193_v33  ;;  %v2088_v36 = vpop.f32.mrb[29].mxu0  ;;  %v2163_v38 = vpack.c.bf16 %v2153_v30, %v2152_v26 }
 0x2cf   : > { %v3284_v5 = vadd.f32 %v4178_v16, %v2088_v36  ;;  %v3194_v11 = vpop.f32.mrb[30].mxu0  ;;  %v2162_v40 = vpack.c.bf16 %v2151_v32, %v2150_v46  ;;  %v2785_v46 = vld [vmem:[%s3595_s10 + $0x28] sm:$0xff]   ;;  %v2771_v36 = vunpack.c.l.bf16 %v2786_v18 }
 0x2d0   : > { %v2140_v34 = vadd.f32 %v3281_v7, %v4187_v51  ;;  %v3287_v43 = vadd.f32 %v4189_v42, %v3194_v11  ;;  %v2091_v55 = vpop.f32.mrb[31].mxu0  ;;  %v2782_v42 = vld [vmem:[%s3595_s10 + $0x10] sm:$0xff]   ;;  %v2767_v11 = vunpack.c.l.bf16 %v2785_v46 }
 0x2d1   : > { %v2138_v59 = vadd.f32 %v3284_v5, %v4187_v51  ;;  %v3290_v1 = vadd.f32 %v4180_v25, %v2091_v55  ;;  %3219 = vmatprep.mubr.bf16.mxu1 %v2162_v40  ;;  %v4227_v25 = vld [vmem:[%s4288_s6] ss:$0 sm:$0xff]  ;;  %v2755_v57 = vunpack.c.l.bf16 %v2782_v42  ;;  %v2756_v58 = vunpack.c.h.bf16 %v2782_v42  ;;  %v2787_v42 = vld [vmem:[%s3595_s10 + $0x38] sm:$0xff]  }
 0x2d2   : > { %v2141_v39 = vadd.f32 %v3287_v43, %v4187_v51  ;;  %3220 = vmatmul.mubr.bf16.gmra.mrb[76].mxu1 %v2163_v38  ;;  %v2156_v16 = vmax.f32 %v2140_v34, 0.0  ;;  %v2772_v43 = vunpack.c.h.bf16 %v2786_v18 }
 0x2d3   : > { %v2139_v15 = vadd.f32 %v3290_v1, %v4187_v51  ;;  %v2154_v21 = vmax.f32 %v2138_v59, 0.0  ;;  %v2751_v51 = vunpack.c.l.bf16 %v2781_v56  ;;  %v2768_v1 = vunpack.c.h.bf16 %v2785_v46 }
 0x2d4   : > { %v2157_v49 = vmax.f32 %v2141_v39, 0.0 }
 0x2d5   : > { %v2155_v37 = vmax.f32 %v2139_v15, 0.0 }
 0x2d6   : > { %v2165_v50 = vpack.c.bf16 %v2157_v49, %v2156_v16 }
 0x2d7   : > { %v2164_v53 = vpack.c.bf16 %v2155_v37, %v2154_v21  ;;  %v2788_v37 = vld [vmem:[%s3595_s10 + $0x40] sm:$0xff]  }
 0x2d9   : > { %3223 = vmatprep.mubr.bf16.mxu1 %v2164_v53 }
 0x2da   : > { %3224 = vmatmul.mubr.bf16.gmra.mrb[80].mxu1 %v2165_v50 }
 0x395   : > { %v3213_v60 = vpop.f32.mrb[68].mxu1 }
 0x396   : > { %v2316_v52 = vadd.f32 %v3213_v60, %v4227_v25  ;;  %v2307_v61 = vpop.f32.mrb[69].mxu1 }
 0x397   : > { %v2308_v31 = vadd.f32 %v4227_v25, %v2307_v61  ;;  %v3214_v63 = vpop.f32.mrb[70].mxu1 }
 0x398   : > { %v2372_v54 = vadd.f32 %v2755_v57, %v2316_v52  ;;  %v2319_v62 = vadd.f32 %v3214_v63, %v4227_v25  ;;  %v2310_v3 = vpop.f32.mrb[71].mxu1 }
 0x399   : > { %v2370_v41 = vadd.f32 %v2751_v51, %v2308_v31  ;;  %v2311_v35 = vadd.f32 %v4227_v25, %v2310_v3  ;;  %v2779_v51 = vunpack.c.l.bf16 %v2788_v37  ;;  %v2776_v3 = vunpack.c.h.bf16 %v2787_v42 }
 0x39a   : > { %v2388_v45 = vmax.f32 %v2372_v54, 0.0  ;;  %v2373_v10 = vadd.f32 %v2756_v58, %v2319_v62  ;;  %v2775_v58 = vunpack.c.l.bf16 %v2787_v42 }
 0x39b   : > { %v2386_v29 = vmax.f32 %v2370_v41, 0.0  ;;  %v2371_v19 = vadd.f32 %v2752_v0, %v2311_v35  ;;  %v2780_v0 = vunpack.c.h.bf16 %v2788_v37 }
 0x39c   : > { %2404 = vst [vmem:[%s3600_s25 + $0x10] sm:$0xff] %v2388_v45  ;;  %v2389_v20 = vmax.f32 %v2373_v10, 0.0 }
 0x39d   : > { %2402 = vst [vmem:[%s3600_s25] sm:$0xff] %v2386_v29  ;;  %v2387_v24 = vmax.f32 %v2371_v19, 0.0  ;;  %v3217_v9 = vpop.f32.mrb[72].mxu1 }
 0x39e   : > { %2405 = vst [vmem:[%s3600_s25 + $0x18] sm:$0xff] %v2389_v20  ;;  %v2332_v27 = vadd.f32 %v3217_v9, %v4227_v25  ;;  %v2323_v23 = vpop.f32.mrb[73].mxu1 }
 0x39f   : > { %2403 = vst [vmem:[%s3600_s25 + $0x8] sm:$0xff] %v2387_v24  ;;  %v2324_v4 = vadd.f32 %v4227_v25, %v2323_v23  ;;  %v3218_v22 = vpop.f32.mrb[74].mxu1 }
 0x3a0   : > { %v2376_v48 = vadd.f32 %v2763_v8, %v2332_v27  ;;  %v2335_v28 = vadd.f32 %v3218_v22, %v4227_v25  ;;  %v2326_v44 = vpop.f32.mrb[75].mxu1 }
 0x3a1   : > { %v2374_v14 = vadd.f32 %v2759_v2, %v2324_v4  ;;  %v2327_v17 = vadd.f32 %v4227_v25, %v2326_v44 }
 0x3a2   : > { %v2392_v26 = vmax.f32 %v2376_v48, 0.0  ;;  %v2377_v30 = vadd.f32 %v2764_v13, %v2335_v28 }
 0x3a3   : > { %v2390_v32 = vmax.f32 %v2374_v14, 0.0  ;;  %v2375_v33 = vadd.f32 %v2760_v12, %v2327_v17 }
 0x3a4   : > { %2408 = vst [vmem:[%s3600_s25 + $0x30] sm:$0xff] %v2392_v26  ;;  %v2393_v7 = vmax.f32 %v2377_v30, 0.0 }
 0x3a5   : > { %2406 = vst [vmem:[%s3600_s25 + $0x20] sm:$0xff] %v2390_v32  ;;  %v2391_v38 = vmax.f32 %v2375_v33, 0.0  ;;  %v3221_v5 = vpop.f32.mrb[76].mxu1 }
 0x3a6   : > { %2409 = vst [vmem:[%s3600_s25 + $0x38] sm:$0xff] %v2393_v7  ;;  %v2348_v40 = vadd.f32 %v3221_v5, %v4227_v25  ;;  %v2339_v34 = vpop.f32.mrb[77].mxu1 }
 0x3a7   : > { %2407 = vst [vmem:[%s3600_s25 + $0x28] sm:$0xff] %v2391_v38  ;;  %v2340_v55 = vadd.f32 %v4227_v25, %v2339_v34  ;;  %v3222_v59 = vpop.f32.mrb[78].mxu1 }
 0x3a8   : > { %v2380_v39 = vadd.f32 %v2771_v36, %v2348_v40  ;;  %v2351_v15 = vadd.f32 %v3222_v59, %v4227_v25  ;;  %v2342_v16 = vpop.f32.mrb[79].mxu1 }
 0x3a9   : > { %v2378_v49 = vadd.f32 %v2767_v11, %v2340_v55  ;;  %v2343_v21 = vadd.f32 %v4227_v25, %v2342_v16 }
 0x3aa   : > { %v2396_v50 = vmax.f32 %v2380_v39, 0.0  ;;  %v2381_v53 = vadd.f32 %v2772_v43, %v2351_v15 }
 0x3ab   : > { %v2394_v56 = vmax.f32 %v2378_v49, 0.0  ;;  %v2379_v57 = vadd.f32 %v2768_v1, %v2343_v21 }
 0x3ac   : > { %2412 = vst [vmem:[%s3600_s25 + $0x50] sm:$0xff] %v2396_v50  ;;  %v2397_v60 = vmax.f32 %v2381_v53, 0.0 }
 0x3ad   : > { %2410 = vst [vmem:[%s3600_s25 + $0x40] sm:$0xff] %v2394_v56  ;;  %v2395_v52 = vmax.f32 %v2379_v57, 0.0  ;;  %v3225_v61 = vpop.f32.mrb[80].mxu1 }
 0x3ae   : > { %2413 = vst [vmem:[%s3600_s25 + $0x58] sm:$0xff] %v2397_v60  ;;  %v2364_v31 = vadd.f32 %v3225_v61, %v4227_v25  ;;  %v2355_v63 = vpop.f32.mrb[81].mxu1 }
 0x3af   : > { %2411 = vst [vmem:[%s3600_s25 + $0x48] sm:$0xff] %v2395_v52  ;;  %v2356_v54 = vadd.f32 %v4227_v25, %v2355_v63  ;;  %v3226_v62 = vpop.f32.mrb[82].mxu1 }
 0x3b0   : > { %v2384_v41 = vadd.f32 %v2779_v51, %v2364_v31  ;;  %v2367_v35 = vadd.f32 %v3226_v62, %v4227_v25  ;;  %v2358_v6 = vpop.f32.mrb[83].mxu1 }
 0x3b1   : > { %v2382_v45 = vadd.f32 %v2775_v58, %v2356_v54  ;;  %v2359_v10 = vadd.f32 %v4227_v25, %v2358_v6 }
 0x3b2   : > { %v2400_v47 = vmax.f32 %v2384_v41, 0.0  ;;  %v2385_v29 = vadd.f32 %v2780_v0, %v2367_v35 }
 0x3b3   : > { %v2398_v19 = vmax.f32 %v2382_v45, 0.0  ;;  %v2383_v20 = vadd.f32 %v2776_v3, %v2359_v10 }
 0x3b4   : > { %2416 = vst [vmem:[%s3600_s25 + $0x70] sm:$0xff] %v2400_v47  ;;  %v2401_v8 = vmax.f32 %v2385_v29, 0.0 }
 0x3b5   : > { %2414 = vst [vmem:[%s3600_s25 + $0x60] sm:$0xff] %v2398_v19  ;;  %v2399_v24 = vmax.f32 %v2383_v20, 0.0 }
 0x3b6   : > { %2417 = vst [vmem:[%s3600_s25 + $0x78] sm:$0xff] %v2401_v8 }
 0x3b7   : > { %2415 = vst [vmem:[%s3600_s25 + $0x68] sm:$0xff] %v2399_v24 }
 0x3b8 PF: > { %s17_s28 = sadd.s32 1, %s3502_s28   ;;  %s4298_s24 = smov %s3494_s26 }
 0x3b9   : > { %p14_p9 = scmp.ge.s32.totalorder %s17_s28, 6   ;;  %s4299_s25 = smov %s3498_s27 }
 0x3ba   : > { %s4300_s26 = smov %s4303_s29  ;;  %s4301_s27 = smov %s4307_s30 }
 0x3bb   :  { %16 = sbr.rel (!%p14_p9) target bundleno = 3 (0x3), region = 93 }

</bundles_post_ra>
